<compile_context>
chip_gen: v7x
topology: tpu7x:2x2x1
jax: 0.10.0
libtpu: 0.0.40
codegen_flags: <defaults>
</compile_context>

<pallas_src>
import math
import functools

import jax
import jax.numpy as jnp
from jax.experimental import pallas as pl
from jax.experimental.pallas import tpu as pltpu


# ---------------------------------------------------------------------------
# In-kernel helpers
# ---------------------------------------------------------------------------
def _layer_norm(x, w, b, eps=1e-5):
    mu = jnp.mean(x, axis=-1, keepdims=True)
    var = jnp.mean((x - mu) ** 2, axis=-1, keepdims=True)
    return (x - mu) * jax.lax.rsqrt(var + eps) * w + b


def _bf16_dot(a, b):
    # bf16 MXU matmul with f32 accumulation.
    return jnp.dot(a.astype(jnp.bfloat16), b.astype(jnp.bfloat16),
                   preferred_element_type=jnp.float32)


def _bf16_einsum(eq, a, b):
    return jnp.einsum(eq, a.astype(jnp.bfloat16), b.astype(jnp.bfloat16),
                      preferred_element_type=jnp.float32)


_PER_LAYER = 12  # refs per encoder layer (see flat param order below)


# ---------------------------------------------------------------------------
# Fused forward kernel
# ---------------------------------------------------------------------------
def _fused_forward_kernel(B, T, n_head, num_layers, aggregate, *refs):
    refs = list(refs)
    o_ref = refs.pop()                                  # output is the last ref
    x_ref, addin_ref, bias_ref, aggw_ref, w_in_ref = refs[:5]
    layer_refs = refs[5:]

    # Input projection; positional encoding + input-proj bias pre-folded in `addin`.
    x = _bf16_dot(x_ref[...], w_in_ref[...]) + addin_ref[...]          # (B*T, D) f32
    D = x.shape[-1]
    hd = D // n_head
    scale = 1.0 / math.sqrt(hd)
    bias = bias_ref[...]                                               # (B, T, T) f32

    for l in range(num_layers):
        (wqkv_r, bqkv_r, wo_r, bo_r, ln1w_r, ln1b_r,
         w1_r, b1_r, w2_r, b2_r, ln2w_r, ln2b_r) = \
            layer_refs[l * _PER_LAYER:(l + 1) * _PER_LAYER]

        wqkv = wqkv_r[...]          # (H, D, 3*hd) bf16, pre-transposed & per-head
        bqkv = bqkv_r[...]          # (H, 1, 3*hd) f32
        wo = wo_r[...]              # (H, hd, D)   bf16

        attn_rows = []
        for b in range(B):          # B small & static; T rows are sublane-aligned
            xb = x[b * T:(b + 1) * T, :]                                # (T, D)
            xh = jnp.broadcast_to(xb[None], (n_head, T, D))             # (H, T, D)
            qkv = _bf16_einsum('htd,hde->hte', xh, wqkv) + bqkv         # (H, T, 3*hd)
            q = qkv[:, :, :hd]
            k = qkv[:, :, hd:2 * hd]
            v = qkv[:, :, 2 * hd:]
            s = _bf16_einsum('hqd,hkd->hqk', q, k) * scale + bias[b]    # (H, T, T) f32
            m = jnp.max(s, axis=-1, keepdims=True)
            p = jnp.exp(s - m)
            p = p * pl.reciprocal(jnp.sum(p, axis=-1, keepdims=True), approx=True)
            ctx = _bf16_einsum('hqk,hkd->hqd', p, v)                    # (H, T, hd)
            # per-head output projection; summing heads avoids a lane-axis concat
            attn_rows.append(_bf16_einsum('hqd,hde->hqe', ctx, wo).sum(axis=0))
        attn = jnp.concatenate(attn_rows, axis=0) + bo_r[...]           # (B*T, D)

        x = _layer_norm(x + attn, ln1w_r[...], ln1b_r[...])
        h1 = jnp.maximum(_bf16_dot(x, w1_r[...]) + b1_r[...], 0.0)      # ReLU
        ff = _bf16_dot(h1, w2_r[...]) + b2_r[...]
        x = _layer_norm(x + ff, ln2w_r[...], ln2b_r[...])

    if aggregate:
        # padding-masked mean over T as a tiny f32 matmul: (B, B*T) @ (B*T, D)
        o_ref[...] = jnp.dot(aggw_ref[...], x, preferred_element_type=jnp.float32)
    else:
        o_ref[...] = x


# ---------------------------------------------------------------------------
# Masks, positional encoding, parameter packing
# ---------------------------------------------------------------------------
def positional_encoding(T, d_model):
    pos = jnp.arange(T, dtype=jnp.float32)[:, None]
    div = jnp.exp(jnp.arange(0, d_model, 2, dtype=jnp.float32)
                  * (-math.log(10000.0) / d_model))
    pe = jnp.zeros((T, d_model), jnp.float32)
    pe = pe.at[:, 0::2].set(jnp.sin(pos * div))
    pe = pe.at[:, 1::2].set(jnp.cos(pos * div))
    return pe


def build_masks(B, T, obs_length, context_length, mask_type):
    # padding mask: True at padded positions (arange > obs_length), matches get_padding_mask.
    padding_mask = jnp.arange(T)[None, :] > obs_length[:, None]          # (B, T) bool

    ii = jnp.arange(T)[:, None]      # query index
    jj = jnp.arange(T)[None, :]      # key index
    if mask_type == "forward":
        causal = jj > ii                                                 # (T, T)
        if context_length >= 0:
            # matches get_sequence_mask's loops: mask[k, i, :i-context_length] = 1
            # for i < obs_length[k] and i > context_length.
            ctx = (jj < ii - context_length)[None, :, :] & \
                  (ii[None, :, :] < obs_length[:, None, None])           # (B, T, T)
            seq_mask = causal[None, :, :] | ctx
        else:
            seq_mask = jnp.broadcast_to(causal, (B, T, T))
    elif mask_type == "complete":
        seq_mask = jnp.zeros((B, T, T), dtype=bool)
    else:
        raise NotImplementedError("This mask type is not implemented")

    total = seq_mask | padding_mask[:, None, :]                          # (B, T, T)
    attn_bias = jnp.where(total, jnp.float32(-1e30), jnp.float32(0.0))   # NOT head-replicated
    return padding_mask, attn_bias


def init_params(key, input_dim, d_dim, n_head, hidden_dim, num_layers):
    """PyTorch-style parameters: Linear weights are (out_features, in_features), f32."""
    def lin(k, out_f, in_f):
        kw, kb = jax.random.split(k)
        lim = 1.0 / math.sqrt(in_f)
        w = jax.random.uniform(kw, (out_f, in_f), jnp.float32, -lim, lim)
        b = jax.random.uniform(kb, (1, out_f), jnp.float32, -lim, lim)
        return w, b

    ks = jax.random.split(key, 1 + num_layers)
    in_w, in_b = lin(ks[0], d_dim, input_dim)
    layers = []
    for l in range(num_layers):
        kl = jax.random.split(ks[1 + l], 4)
        wqkv, bqkv = lin(kl[0], 3 * d_dim, d_dim)
        wo, bo = lin(kl[1], d_dim, d_dim)
        w1, b1 = lin(kl[2], hidden_dim, d_dim)
        w2, b2 = lin(kl[3], d_dim, hidden_dim)
        layers.append(dict(
            wqkv=wqkv, bqkv=bqkv, wo=wo, bo=bo,
            ln1w=jnp.ones((1, d_dim), jnp.float32), ln1b=jnp.zeros((1, d_dim), jnp.float32),
            w1=w1, b1=b1, w2=w2, b2=b2,
            ln2w=jnp.ones((1, d_dim), jnp.float32), ln2b=jnp.zeros((1, d_dim), jnp.float32)))
    return dict(in_w=in_w, in_b=in_b, layers=layers)


def pack_params(params, n_head):
    """Pre-transpose all weights to (in, out) / per-head layout; matmul weights in bf16."""
    bf16 = jnp.bfloat16
    D = params["in_w"].shape[0]
    hd = D // n_head
    packed = {"w_in": params["in_w"].T.astype(bf16)}                     # (F, D)
    layers = []
    for p in params["layers"]:
        wq, wk, wv = p["wqkv"][:D], p["wqkv"][D:2 * D], p["wqkv"][2 * D:]
        bq, bk, bv = p["bqkv"][0, :D], p["bqkv"][0, D:2 * D], p["bqkv"][0, 2 * D:]
        wqkv_h = jnp.stack(
            [jnp.concatenate([wq[h * hd:(h + 1) * hd].T,
                              wk[h * hd:(h + 1) * hd].T,
                              wv[h * hd:(h + 1) * hd].T], axis=1)
             for h in range(n_head)], axis=0).astype(bf16)               # (H, D, 3*hd)
        bqkv_h = jnp.stack(
            [jnp.concatenate([bq[h * hd:(h + 1) * hd],
                              bk[h * hd:(h + 1) * hd],
                              bv[h * hd:(h + 1) * hd]])[None, :]
             for h in range(n_head)], axis=0)                            # (H, 1, 3*hd) f32
        wo_t = p["wo"].T                                                 # (D, D)
        wo_h = jnp.stack([wo_t[h * hd:(h + 1) * hd] for h in range(n_head)],
                         axis=0).astype(bf16)                            # (H, hd, D)
        layers.append(dict(
            wqkv=wqkv_h, bqkv=bqkv_h, wo=wo_h, bo=p["bo"],
            ln1w=p["ln1w"], ln1b=p["ln1b"],
            w1=p["w1"].T.astype(bf16), b1=p["b1"],
            w2=p["w2"].T.astype(bf16), b2=p["b2"],
            ln2w=p["ln2w"], ln2b=p["ln2b"]))
    packed["layers"] = layers
    return packed


# ---------------------------------------------------------------------------
# Wrapper: single fused pallas_call
# ---------------------------------------------------------------------------
def trajectory_transformer_forward(params, trajectory, obs_length, *, n_head,
                                   context_length, mask_type="forward",
                                   aggregate=True, use_positional_encoding=True):
    B, T, F = trajectory.shape
    D = params["in_w"].shape[0]
    num_layers = len(params["layers"])

    padding_mask, attn_bias = build_masks(B, T, obs_length, context_length, mask_type)

    pe = positional_encoding(T, D) if use_positional_encoding else jnp.zeros((T, D), jnp.float32)
    # TODO(synk): dropout (p>0) is a no-op here (eval-mode semantics).
    addin = jnp.tile(pe, (B, 1)) + params["in_b"]                        # (B*T, D)

    # Block-diagonal aggregation matrix: row b = (valid mask of batch b) / valid-count.
    valid = (~padding_mask).astype(jnp.float32)                          # (B, T)
    count = valid.sum(axis=1, keepdims=True)                             # (B, 1)
    aggw = (jnp.eye(B, dtype=jnp.float32)[:, :, None]
            * (valid / count)[:, None, :]).reshape(B, B * T)             # (B, B*T)

    kp = pack_params(params, n_head)
    flat = [kp["w_in"]]
    for lp in kp["layers"]:
        flat += [lp[k] for k in ("wqkv", "bqkv", "wo", "bo", "ln1w", "ln1b",
                                 "w1", "b1", "w2", "b2", "ln2w", "ln2b")]

    out_shape = (B, D) if aggregate else (B * T, D)
    vmem = pl.BlockSpec(memory_space=pltpu.MemorySpace.VMEM)
    out = pl.pallas_call(
        functools.partial(_fused_forward_kernel, B, T, n_head, num_layers, aggregate),
        out_shape=jax.ShapeDtypeStruct(out_shape, jnp.float32),
        in_specs=[vmem] * (4 + len(flat)),
        out_specs=vmem,
    )(trajectory.reshape(B * T, F), addin, attn_bias, aggw, *flat)

    return out if aggregate else out.reshape(B, T, D)


# ---------------------------------------------------------------------------
# Pure-JAX reference (same math & same bf16 matmul quantization, no Pallas)
# ---------------------------------------------------------------------------
def _ln_ref(x, w, b, eps=1e-5):
    mu = x.mean(-1, keepdims=True)
    var = ((x - mu) ** 2).mean(-1, keepdims=True)
    return (x - mu) * jax.lax.rsqrt(var + eps) * w + b


def _bdot_ref(eq, a, b):
    return jnp.einsum(eq, a.astype(jnp.bfloat16), b.astype(jnp.bfloat16),
                      preferred_element_type=jnp.float32)


def reference_forward(params, trajectory, obs_length, *, n_head, context_length,
                      mask_type="forward", aggregate=True, use_positional_encoding=True):
    B, T, _ = trajectory.shape
    D = params["in_w"].shape[0]
    padding_mask, attn_bias = build_masks(B, T, obs_length, context_length, mask_type)
    pe = positional_encoding(T, D) if use_positional_encoding else 0.0
    x = _bdot_ref("btf,df->btd", trajectory, params["in_w"]) + params["in_b"][0] + pe

    hd = D // n_head
    for p in params["layers"]:
        qkv = _bdot_ref("btd,ed->bte", x, p["wqkv"]) + p["bqkv"][0]
        q, k, v = qkv[..., :D], qkv[..., D:2 * D], qkv[..., 2 * D:]
        q = q.reshape(B, T, n_head, hd).transpose(0, 2, 1, 3)
        k = k.reshape(B, T, n_head, hd).transpose(0, 2, 1, 3)
        v = v.reshape(B, T, n_head, hd).transpose(0, 2, 1, 3)
        s = _bdot_ref("bhqd,bhkd->bhqk", q, k) / math.sqrt(hd) + attn_bias[:, None]
        a = jax.nn.softmax(s, axis=-1)
        ctx = _bdot_ref("bhqk,bhkd->bhqd", a, v).transpose(0, 2, 1, 3).reshape(B, T, D)
        attn = _bdot_ref("btd,ed->bte", ctx, p["wo"]) + p["bo"][0]
        x = _ln_ref(x + attn, p["ln1w"][0], p["ln1b"][0])
        h = jax.nn.relu(_bdot_ref("btd,hd->bth", x, p["w1"]) + p["b1"][0])
        ff = _bdot_ref("bth,dh->btd", h, p["w2"]) + p["b2"][0]
        x = _ln_ref(x + ff, p["ln2w"][0], p["ln2b"][0])

    if aggregate:
        x = x * (~padding_mask)[:, :, None].astype(x.dtype)
        x = x.sum(1) / (T - padding_mask.sum(1)).astype(x.dtype)[:, None]
    return x


# ---------------------------------------------------------------------------
if __name__ == "__main__":
    B, T, input_dim = 2, 8, 16
    d_dim, n_head, hidden_dim, num_layers = 32, 4, 64, 2
    context_length = 2

    key = jax.random.PRNGKey(0)
    kp, kx = jax.random.split(key)
    params = init_params(kp, input_dim, d_dim, n_head, hidden_dim, num_layers)
    trajectory = jax.random.normal(kx, (B, T, input_dim), jnp.float32)
    obs_length = jnp.array([5, 7], dtype=jnp.int32)

    out = trajectory_transformer_forward(params, trajectory, obs_length,
                                         n_head=n_head, context_length=context_length,
                                         mask_type="forward", aggregate=True,
                                         use_positional_encoding=True)
    out = jax.block_until_ready(out)
    assert out.shape == (B, d_dim), out.shape

    ref = reference_forward(params, trajectory, obs_length,
                            n_head=n_head, context_length=context_length,
                            mask_type="forward", aggregate=True,
                            use_positional_encoding=True)
    err = float(jnp.max(jnp.abs(out - ref)))
    assert err < 2e-2, f"max abs err vs reference: {err}"
    print("KERNEL_OK")
</pallas_src>

<mosaic_0001>
module attributes {stable_mosaic.version = 11 : i64} {
  func.func @_fused_forward_kernel(%arg0: memref<16x16xf32, #tpu.memory_space<vmem>>, %arg1: memref<16x32xf32, #tpu.memory_space<vmem>>, %arg2: memref<2x8x8xf32, #tpu.memory_space<vmem>>, %arg3: memref<2x16xf32, #tpu.memory_space<vmem>>, %arg4: memref<16x32xbf16, #tpu.memory_space<vmem>>, %arg5: memref<4x32x24xbf16, #tpu.memory_space<vmem>>, %arg6: memref<4x1x24xf32, #tpu.memory_space<vmem>>, %arg7: memref<4x8x32xbf16, #tpu.memory_space<vmem>>, %arg8: memref<1x32xf32, #tpu.memory_space<vmem>>, %arg9: memref<1x32xf32, #tpu.memory_space<vmem>>, %arg10: memref<1x32xf32, #tpu.memory_space<vmem>>, %arg11: memref<32x64xbf16, #tpu.memory_space<vmem>>, %arg12: memref<1x64xf32, #tpu.memory_space<vmem>>, %arg13: memref<64x32xbf16, #tpu.memory_space<vmem>>, %arg14: memref<1x32xf32, #tpu.memory_space<vmem>>, %arg15: memref<1x32xf32, #tpu.memory_space<vmem>>, %arg16: memref<1x32xf32, #tpu.memory_space<vmem>>, %arg17: memref<4x32x24xbf16, #tpu.memory_space<vmem>>, %arg18: memref<4x1x24xf32, #tpu.memory_space<vmem>>, %arg19: memref<4x8x32xbf16, #tpu.memory_space<vmem>>, %arg20: memref<1x32xf32, #tpu.memory_space<vmem>>, %arg21: memref<1x32xf32, #tpu.memory_space<vmem>>, %arg22: memref<1x32xf32, #tpu.memory_space<vmem>>, %arg23: memref<32x64xbf16, #tpu.memory_space<vmem>>, %arg24: memref<1x64xf32, #tpu.memory_space<vmem>>, %arg25: memref<64x32xbf16, #tpu.memory_space<vmem>>, %arg26: memref<1x32xf32, #tpu.memory_space<vmem>>, %arg27: memref<1x32xf32, #tpu.memory_space<vmem>>, %arg28: memref<1x32xf32, #tpu.memory_space<vmem>>, %arg29: memref<2x32xf32, #tpu.memory_space<vmem>>) attributes {dimension_semantics = [], scalar_prefetch = 0 : i64, scratch_operands = 0 : i64, tpu.core_type = #tpu.core_type<tc>} {
    %c0 = arith.constant 0 : index
    %c0_0 = arith.constant 0 : index
    %0 = vector.load %arg0[%c0, %c0_0] : memref<16x16xf32, #tpu.memory_space<vmem>>, vector<16x16xf32>
    %c0_1 = arith.constant 0 : index
    %c0_2 = arith.constant 0 : index
    %1 = vector.load %arg4[%c0_1, %c0_2] : memref<16x32xbf16, #tpu.memory_space<vmem>>, vector<16x32xbf16>
    %2 = arith.truncf %0 : vector<16x16xf32> to vector<16x16xbf16>
    %cst = arith.constant dense<0.000000e+00> : vector<16x32xf32>
    %3 = tpu.matmul %2, %1, %cst {dimension_numbers = #tpu.dot_dimension_numbers<[1], [0], [0], [1], [0, 0, 1, 1], [], []>} : vector<16x16xbf16>, vector<16x32xbf16>, vector<16x32xf32> -> vector<16x32xf32>
    %c0_3 = arith.constant 0 : index
    %c0_4 = arith.constant 0 : index
    %4 = vector.load %arg1[%c0_3, %c0_4] : memref<16x32xf32, #tpu.memory_space<vmem>>, vector<16x32xf32>
    %5 = arith.addf %3, %4 : vector<16x32xf32>
    %c0_5 = arith.constant 0 : index
    %c0_6 = arith.constant 0 : index
    %c0_7 = arith.constant 0 : index
    %6 = vector.load %arg2[%c0_5, %c0_6, %c0_7] : memref<2x8x8xf32, #tpu.memory_space<vmem>>, vector<2x8x8xf32>
    %c0_8 = arith.constant 0 : index
    %c0_9 = arith.constant 0 : index
    %c0_10 = arith.constant 0 : index
    %7 = vector.load %arg5[%c0_8, %c0_9, %c0_10] : memref<4x32x24xbf16, #tpu.memory_space<vmem>>, vector<4x32x24xbf16>
    %c0_11 = arith.constant 0 : index
    %c0_12 = arith.constant 0 : index
    %c0_13 = arith.constant 0 : index
    %8 = vector.load %arg6[%c0_11, %c0_12, %c0_13] : memref<4x1x24xf32, #tpu.memory_space<vmem>>, vector<4x1x24xf32>
    %c0_14 = arith.constant 0 : index
    %c0_15 = arith.constant 0 : index
    %c0_16 = arith.constant 0 : index
    %9 = vector.load %arg7[%c0_14, %c0_15, %c0_16] : memref<4x8x32xbf16, #tpu.memory_space<vmem>>, vector<4x8x32xbf16>
    %10 = vector.extract_strided_slice %5 {offsets = [0, 0], sizes = [8, 32], strides = [1, 1]} : vector<16x32xf32> to vector<8x32xf32>
    %11 = vector.shape_cast %10 : vector<8x32xf32> to vector<1x8x32xf32>
    %12 = vector.shape_cast %11 : vector<1x8x32xf32> to vector<1x8x32xf32>
    %13 = vector.broadcast %12 : vector<1x8x32xf32> to vector<4x8x32xf32>
    %14 = arith.truncf %13 : vector<4x8x32xf32> to vector<4x8x32xbf16>
    "tpu.trace_start"() <{level = 10 : i32, message = "htd,hde->hte"}> : () -> ()
    %cst_17 = arith.constant dense<0.000000e+00> : vector<4x8x24xf32>
    %15 = tpu.matmul %14, %7, %cst_17 {dimension_numbers = #tpu.dot_dimension_numbers<[2], [1], [1], [2], [0, 0, 0, 1, 1, 2], [0], [0]>} : vector<4x8x32xbf16>, vector<4x32x24xbf16>, vector<4x8x24xf32> -> vector<4x8x24xf32>
    "tpu.trace_stop"() : () -> ()
    %16 = vector.broadcast %8 : vector<4x1x24xf32> to vector<4x8x24xf32>
    %17 = arith.addf %15, %16 : vector<4x8x24xf32>
    %18 = vector.extract_strided_slice %17 {offsets = [0, 0, 0], sizes = [4, 8, 8], strides = [1, 1, 1]} : vector<4x8x24xf32> to vector<4x8x8xf32>
    %19 = vector.extract_strided_slice %17 {offsets = [0, 0, 8], sizes = [4, 8, 8], strides = [1, 1, 1]} : vector<4x8x24xf32> to vector<4x8x8xf32>
    %20 = vector.extract_strided_slice %17 {offsets = [0, 0, 16], sizes = [4, 8, 8], strides = [1, 1, 1]} : vector<4x8x24xf32> to vector<4x8x8xf32>
    %21 = arith.truncf %18 : vector<4x8x8xf32> to vector<4x8x8xbf16>
    %22 = arith.truncf %19 : vector<4x8x8xf32> to vector<4x8x8xbf16>
    "tpu.trace_start"() <{level = 10 : i32, message = "hqd,hkd->hqk"}> : () -> ()
    %cst_18 = arith.constant dense<0.000000e+00> : vector<4x8x8xf32>
    %23 = tpu.matmul %21, %22, %cst_18 {dimension_numbers = #tpu.dot_dimension_numbers<[2], [2], [1], [1], [0, 0, 0, 1, 1, 1], [0], [0]>} : vector<4x8x8xbf16>, vector<4x8x8xbf16>, vector<4x8x8xf32> -> vector<4x8x8xf32>
    "tpu.trace_stop"() : () -> ()
    %cst_19 = arith.constant 0.353553385 : f32
    %24 = vector.broadcast %cst_19 : f32 to vector<4x8x8xf32>
    %25 = arith.mulf %23, %24 : vector<4x8x8xf32>
    %26 = vector.extract_strided_slice %6 {offsets = [0, 0, 0], sizes = [1, 8, 8], strides = [1, 1, 1]} : vector<2x8x8xf32> to vector<1x8x8xf32>
    %27 = vector.shape_cast %26 : vector<1x8x8xf32> to vector<8x8xf32>
    %28 = vector.shape_cast %27 : vector<8x8xf32> to vector<1x8x8xf32>
    %29 = vector.broadcast %28 : vector<1x8x8xf32> to vector<4x8x8xf32>
    %30 = arith.addf %25, %29 : vector<4x8x8xf32>
    %cst_20 = arith.constant dense<0xFF800000> : vector<4x8xf32>
    %31 = vector.multi_reduction <maximumf>, %30, %cst_20 [2] : vector<4x8x8xf32> to vector<4x8xf32>
    %32 = vector.shape_cast %31 : vector<4x8xf32> to vector<4x8x1xf32>
    %33 = vector.broadcast %32 : vector<4x8x1xf32> to vector<4x8x8xf32>
    %34 = arith.subf %30, %33 : vector<4x8x8xf32>
    %35 = math.exp %34 : vector<4x8x8xf32>
    %cst_21 = arith.constant dense<0.000000e+00> : vector<4x8xf32>
    %36 = vector.multi_reduction <add>, %35, %cst_21 [2] : vector<4x8x8xf32> to vector<4x8xf32>
    %37 = vector.shape_cast %36 : vector<4x8xf32> to vector<4x8x1xf32>
    %38 = tpu.reciprocal %37 {approx = true} : vector<4x8x1xf32> -> vector<4x8x1xf32>
    %39 = vector.broadcast %38 : vector<4x8x1xf32> to vector<4x8x8xf32>
    %40 = arith.mulf %35, %39 : vector<4x8x8xf32>
    %41 = arith.truncf %40 : vector<4x8x8xf32> to vector<4x8x8xbf16>
    %42 = arith.truncf %20 : vector<4x8x8xf32> to vector<4x8x8xbf16>
    "tpu.trace_start"() <{level = 10 : i32, message = "hqk,hkd->hqd"}> : () -> ()
    %cst_22 = arith.constant dense<0.000000e+00> : vector<4x8x8xf32>
    %43 = tpu.matmul %41, %42, %cst_22 {dimension_numbers = #tpu.dot_dimension_numbers<[2], [1], [1], [2], [0, 0, 0, 1, 1, 2], [0], [0]>} : vector<4x8x8xbf16>, vector<4x8x8xbf16>, vector<4x8x8xf32> -> vector<4x8x8xf32>
    "tpu.trace_stop"() : () -> ()
    %44 = arith.truncf %43 : vector<4x8x8xf32> to vector<4x8x8xbf16>
    "tpu.trace_start"() <{level = 10 : i32, message = "hqd,hde->hqe"}> : () -> ()
    %cst_23 = arith.constant dense<0.000000e+00> : vector<4x8x32xf32>
    %45 = tpu.matmul %44, %9, %cst_23 {dimension_numbers = #tpu.dot_dimension_numbers<[2], [1], [1], [2], [0, 0, 0, 1, 1, 2], [0], [0]>} : vector<4x8x8xbf16>, vector<4x8x32xbf16>, vector<4x8x32xf32> -> vector<4x8x32xf32>
    "tpu.trace_stop"() : () -> ()
    %cst_24 = arith.constant dense<0.000000e+00> : vector<8x32xf32>
    %46 = vector.multi_reduction <add>, %45, %cst_24 [0] : vector<4x8x32xf32> to vector<8x32xf32>
    %47 = vector.extract_strided_slice %5 {offsets = [8, 0], sizes = [8, 32], strides = [1, 1]} : vector<16x32xf32> to vector<8x32xf32>
    %48 = vector.shape_cast %47 : vector<8x32xf32> to vector<1x8x32xf32>
    %49 = vector.shape_cast %48 : vector<1x8x32xf32> to vector<1x8x32xf32>
    %50 = vector.broadcast %49 : vector<1x8x32xf32> to vector<4x8x32xf32>
    %51 = arith.truncf %50 : vector<4x8x32xf32> to vector<4x8x32xbf16>
    "tpu.trace_start"() <{level = 10 : i32, message = "htd,hde->hte"}> : () -> ()
    %cst_25 = arith.constant dense<0.000000e+00> : vector<4x8x24xf32>
    %52 = tpu.matmul %51, %7, %cst_25 {dimension_numbers = #tpu.dot_dimension_numbers<[2], [1], [1], [2], [0, 0, 0, 1, 1, 2], [0], [0]>} : vector<4x8x32xbf16>, vector<4x32x24xbf16>, vector<4x8x24xf32> -> vector<4x8x24xf32>
    "tpu.trace_stop"() : () -> ()
    %53 = vector.broadcast %8 : vector<4x1x24xf32> to vector<4x8x24xf32>
    %54 = arith.addf %52, %53 : vector<4x8x24xf32>
    %55 = vector.extract_strided_slice %54 {offsets = [0, 0, 0], sizes = [4, 8, 8], strides = [1, 1, 1]} : vector<4x8x24xf32> to vector<4x8x8xf32>
    %56 = vector.extract_strided_slice %54 {offsets = [0, 0, 8], sizes = [4, 8, 8], strides = [1, 1, 1]} : vector<4x8x24xf32> to vector<4x8x8xf32>
    %57 = vector.extract_strided_slice %54 {offsets = [0, 0, 16], sizes = [4, 8, 8], strides = [1, 1, 1]} : vector<4x8x24xf32> to vector<4x8x8xf32>
    %58 = arith.truncf %55 : vector<4x8x8xf32> to vector<4x8x8xbf16>
    %59 = arith.truncf %56 : vector<4x8x8xf32> to vector<4x8x8xbf16>
    "tpu.trace_start"() <{level = 10 : i32, message = "hqd,hkd->hqk"}> : () -> ()
    %cst_26 = arith.constant dense<0.000000e+00> : vector<4x8x8xf32>
    %60 = tpu.matmul %58, %59, %cst_26 {dimension_numbers = #tpu.dot_dimension_numbers<[2], [2], [1], [1], [0, 0, 0, 1, 1, 1], [0], [0]>} : vector<4x8x8xbf16>, vector<4x8x8xbf16>, vector<4x8x8xf32> -> vector<4x8x8xf32>
    "tpu.trace_stop"() : () -> ()
    %cst_27 = arith.constant 0.353553385 : f32
    %61 = vector.broadcast %cst_27 : f32 to vector<4x8x8xf32>
    %62 = arith.mulf %60, %61 : vector<4x8x8xf32>
    %63 = vector.extract_strided_slice %6 {offsets = [1, 0, 0], sizes = [1, 8, 8], strides = [1, 1, 1]} : vector<2x8x8xf32> to vector<1x8x8xf32>
    %64 = vector.shape_cast %63 : vector<1x8x8xf32> to vector<8x8xf32>
    %65 = vector.shape_cast %64 : vector<8x8xf32> to vector<1x8x8xf32>
    %66 = vector.broadcast %65 : vector<1x8x8xf32> to vector<4x8x8xf32>
    %67 = arith.addf %62, %66 : vector<4x8x8xf32>
    %cst_28 = arith.constant dense<0xFF800000> : vector<4x8xf32>
    %68 = vector.multi_reduction <maximumf>, %67, %cst_28 [2] : vector<4x8x8xf32> to vector<4x8xf32>
    %69 = vector.shape_cast %68 : vector<4x8xf32> to vector<4x8x1xf32>
    %70 = vector.broadcast %69 : vector<4x8x1xf32> to vector<4x8x8xf32>
    %71 = arith.subf %67, %70 : vector<4x8x8xf32>
    %72 = math.exp %71 : vector<4x8x8xf32>
    %cst_29 = arith.constant dense<0.000000e+00> : vector<4x8xf32>
    %73 = vector.multi_reduction <add>, %72, %cst_29 [2] : vector<4x8x8xf32> to vector<4x8xf32>
    %74 = vector.shape_cast %73 : vector<4x8xf32> to vector<4x8x1xf32>
    %75 = tpu.reciprocal %74 {approx = true} : vector<4x8x1xf32> -> vector<4x8x1xf32>
    %76 = vector.broadcast %75 : vector<4x8x1xf32> to vector<4x8x8xf32>
    %77 = arith.mulf %72, %76 : vector<4x8x8xf32>
    %78 = arith.truncf %77 : vector<4x8x8xf32> to vector<4x8x8xbf16>
    %79 = arith.truncf %57 : vector<4x8x8xf32> to vector<4x8x8xbf16>
    "tpu.trace_start"() <{level = 10 : i32, message = "hqk,hkd->hqd"}> : () -> ()
    %cst_30 = arith.constant dense<0.000000e+00> : vector<4x8x8xf32>
    %80 = tpu.matmul %78, %79, %cst_30 {dimension_numbers = #tpu.dot_dimension_numbers<[2], [1], [1], [2], [0, 0, 0, 1, 1, 2], [0], [0]>} : vector<4x8x8xbf16>, vector<4x8x8xbf16>, vector<4x8x8xf32> -> vector<4x8x8xf32>
    "tpu.trace_stop"() : () -> ()
    %81 = arith.truncf %80 : vector<4x8x8xf32> to vector<4x8x8xbf16>
    "tpu.trace_start"() <{level = 10 : i32, message = "hqd,hde->hqe"}> : () -> ()
    %cst_31 = arith.constant dense<0.000000e+00> : vector<4x8x32xf32>
    %82 = tpu.matmul %81, %9, %cst_31 {dimension_numbers = #tpu.dot_dimension_numbers<[2], [1], [1], [2], [0, 0, 0, 1, 1, 2], [0], [0]>} : vector<4x8x8xbf16>, vector<4x8x32xbf16>, vector<4x8x32xf32> -> vector<4x8x32xf32>
    "tpu.trace_stop"() : () -> ()
    %cst_32 = arith.constant dense<0.000000e+00> : vector<8x32xf32>
    %83 = vector.multi_reduction <add>, %82, %cst_32 [0] : vector<4x8x32xf32> to vector<8x32xf32>
    %84 = tpu.concatenate %46, %83 in 0 : vector<8x32xf32>, vector<8x32xf32> -> vector<16x32xf32>
    %c0_33 = arith.constant 0 : index
    %c0_34 = arith.constant 0 : index
    %85 = vector.load %arg8[%c0_33, %c0_34] : memref<1x32xf32, #tpu.memory_space<vmem>>, vector<1x32xf32>
    %86 = vector.broadcast %85 : vector<1x32xf32> to vector<16x32xf32>
    %87 = arith.addf %84, %86 : vector<16x32xf32>
    %88 = arith.addf %5, %87 : vector<16x32xf32>
    %c0_35 = arith.constant 0 : index
    %c0_36 = arith.constant 0 : index
    %89 = vector.load %arg9[%c0_35, %c0_36] : memref<1x32xf32, #tpu.memory_space<vmem>>, vector<1x32xf32>
    %c0_37 = arith.constant 0 : index
    %c0_38 = arith.constant 0 : index
    %90 = vector.load %arg10[%c0_37, %c0_38] : memref<1x32xf32, #tpu.memory_space<vmem>>, vector<1x32xf32>
    %cst_39 = arith.constant dense<0.000000e+00> : vector<16xf32>
    %91 = vector.multi_reduction <add>, %88, %cst_39 [1] : vector<16x32xf32> to vector<16xf32>
    %92 = vector.shape_cast %91 : vector<16xf32> to vector<16x1xf32>
    %cst_40 = arith.constant 3.200000e+01 : f32
    %93 = vector.broadcast %cst_40 : f32 to vector<16x1xf32>
    %94 = arith.divf %92, %93 : vector<16x1xf32>
    %95 = vector.broadcast %94 : vector<16x1xf32> to vector<16x32xf32>
    %96 = arith.subf %88, %95 : vector<16x32xf32>
    %97 = arith.mulf %96, %96 : vector<16x32xf32>
    %cst_41 = arith.constant dense<0.000000e+00> : vector<16xf32>
    %98 = vector.multi_reduction <add>, %97, %cst_41 [1] : vector<16x32xf32> to vector<16xf32>
    %99 = vector.shape_cast %98 : vector<16xf32> to vector<16x1xf32>
    %cst_42 = arith.constant 3.200000e+01 : f32
    %100 = vector.broadcast %cst_42 : f32 to vector<16x1xf32>
    %101 = arith.divf %99, %100 : vector<16x1xf32>
    %102 = vector.broadcast %94 : vector<16x1xf32> to vector<16x32xf32>
    %103 = arith.subf %88, %102 : vector<16x32xf32>
    %cst_43 = arith.constant 9.99999974E-6 : f32
    %104 = vector.broadcast %cst_43 : f32 to vector<16x1xf32>
    %105 = arith.addf %101, %104 : vector<16x1xf32>
    %106 = math.rsqrt %105 : vector<16x1xf32>
    %107 = vector.broadcast %106 : vector<16x1xf32> to vector<16x32xf32>
    %108 = arith.mulf %103, %107 : vector<16x32xf32>
    %109 = vector.broadcast %89 : vector<1x32xf32> to vector<16x32xf32>
    %110 = arith.mulf %108, %109 : vector<16x32xf32>
    %111 = vector.broadcast %90 : vector<1x32xf32> to vector<16x32xf32>
    %112 = arith.addf %110, %111 : vector<16x32xf32>
    %c0_44 = arith.constant 0 : index
    %c0_45 = arith.constant 0 : index
    %113 = vector.load %arg11[%c0_44, %c0_45] : memref<32x64xbf16, #tpu.memory_space<vmem>>, vector<32x64xbf16>
    %114 = arith.truncf %112 : vector<16x32xf32> to vector<16x32xbf16>
    %cst_46 = arith.constant dense<0.000000e+00> : vector<16x64xf32>
    %115 = tpu.matmul %114, %113, %cst_46 {dimension_numbers = #tpu.dot_dimension_numbers<[1], [0], [0], [1], [0, 0, 1, 1], [], []>} : vector<16x32xbf16>, vector<32x64xbf16>, vector<16x64xf32> -> vector<16x64xf32>
    %c0_47 = arith.constant 0 : index
    %c0_48 = arith.constant 0 : index
    %116 = vector.load %arg12[%c0_47, %c0_48] : memref<1x64xf32, #tpu.memory_space<vmem>>, vector<1x64xf32>
    %117 = vector.broadcast %116 : vector<1x64xf32> to vector<16x64xf32>
    %118 = arith.addf %115, %117 : vector<16x64xf32>
    %cst_49 = arith.constant 0.000000e+00 : f32
    %119 = vector.broadcast %cst_49 : f32 to vector<16x64xf32>
    %120 = arith.maximumf %118, %119 : vector<16x64xf32>
    %c0_50 = arith.constant 0 : index
    %c0_51 = arith.constant 0 : index
    %121 = vector.load %arg13[%c0_50, %c0_51] : memref<64x32xbf16, #tpu.memory_space<vmem>>, vector<64x32xbf16>
    %122 = arith.truncf %120 : vector<16x64xf32> to vector<16x64xbf16>
    %cst_52 = arith.constant dense<0.000000e+00> : vector<16x32xf32>
    %123 = tpu.matmul %122, %121, %cst_52 {dimension_numbers = #tpu.dot_dimension_numbers<[1], [0], [0], [1], [0, 0, 1, 1], [], []>} : vector<16x64xbf16>, vector<64x32xbf16>, vector<16x32xf32> -> vector<16x32xf32>
    %c0_53 = arith.constant 0 : index
    %c0_54 = arith.constant 0 : index
    %124 = vector.load %arg14[%c0_53, %c0_54] : memref<1x32xf32, #tpu.memory_space<vmem>>, vector<1x32xf32>
    %125 = vector.broadcast %124 : vector<1x32xf32> to vector<16x32xf32>
    %126 = arith.addf %123, %125 : vector<16x32xf32>
    %127 = arith.addf %112, %126 : vector<16x32xf32>
    %c0_55 = arith.constant 0 : index
    %c0_56 = arith.constant 0 : index
    %128 = vector.load %arg15[%c0_55, %c0_56] : memref<1x32xf32, #tpu.memory_space<vmem>>, vector<1x32xf32>
    %c0_57 = arith.constant 0 : index
    %c0_58 = arith.constant 0 : index
    %129 = vector.load %arg16[%c0_57, %c0_58] : memref<1x32xf32, #tpu.memory_space<vmem>>, vector<1x32xf32>
    %cst_59 = arith.constant dense<0.000000e+00> : vector<16xf32>
    %130 = vector.multi_reduction <add>, %127, %cst_59 [1] : vector<16x32xf32> to vector<16xf32>
    %131 = vector.shape_cast %130 : vector<16xf32> to vector<16x1xf32>
    %cst_60 = arith.constant 3.200000e+01 : f32
    %132 = vector.broadcast %cst_60 : f32 to vector<16x1xf32>
    %133 = arith.divf %131, %132 : vector<16x1xf32>
    %134 = vector.broadcast %133 : vector<16x1xf32> to vector<16x32xf32>
    %135 = arith.subf %127, %134 : vector<16x32xf32>
    %136 = arith.mulf %135, %135 : vector<16x32xf32>
    %cst_61 = arith.constant dense<0.000000e+00> : vector<16xf32>
    %137 = vector.multi_reduction <add>, %136, %cst_61 [1] : vector<16x32xf32> to vector<16xf32>
    %138 = vector.shape_cast %137 : vector<16xf32> to vector<16x1xf32>
    %cst_62 = arith.constant 3.200000e+01 : f32
    %139 = vector.broadcast %cst_62 : f32 to vector<16x1xf32>
    %140 = arith.divf %138, %139 : vector<16x1xf32>
    %141 = vector.broadcast %133 : vector<16x1xf32> to vector<16x32xf32>
    %142 = arith.subf %127, %141 : vector<16x32xf32>
    %cst_63 = arith.constant 9.99999974E-6 : f32
    %143 = vector.broadcast %cst_63 : f32 to vector<16x1xf32>
    %144 = arith.addf %140, %143 : vector<16x1xf32>
    %145 = math.rsqrt %144 : vector<16x1xf32>
    %146 = vector.broadcast %145 : vector<16x1xf32> to vector<16x32xf32>
    %147 = arith.mulf %142, %146 : vector<16x32xf32>
    %148 = vector.broadcast %128 : vector<1x32xf32> to vector<16x32xf32>
    %149 = arith.mulf %147, %148 : vector<16x32xf32>
    %150 = vector.broadcast %129 : vector<1x32xf32> to vector<16x32xf32>
    %151 = arith.addf %149, %150 : vector<16x32xf32>
    %c0_64 = arith.constant 0 : index
    %c0_65 = arith.constant 0 : index
    %c0_66 = arith.constant 0 : index
    %152 = vector.load %arg17[%c0_64, %c0_65, %c0_66] : memref<4x32x24xbf16, #tpu.memory_space<vmem>>, vector<4x32x24xbf16>
    %c0_67 = arith.constant 0 : index
    %c0_68 = arith.constant 0 : index
    %c0_69 = arith.constant 0 : index
    %153 = vector.load %arg18[%c0_67, %c0_68, %c0_69] : memref<4x1x24xf32, #tpu.memory_space<vmem>>, vector<4x1x24xf32>
    %c0_70 = arith.constant 0 : index
    %c0_71 = arith.constant 0 : index
    %c0_72 = arith.constant 0 : index
    %154 = vector.load %arg19[%c0_70, %c0_71, %c0_72] : memref<4x8x32xbf16, #tpu.memory_space<vmem>>, vector<4x8x32xbf16>
    %155 = vector.extract_strided_slice %151 {offsets = [0, 0], sizes = [8, 32], strides = [1, 1]} : vector<16x32xf32> to vector<8x32xf32>
    %156 = vector.shape_cast %155 : vector<8x32xf32> to vector<1x8x32xf32>
    %157 = vector.shape_cast %156 : vector<1x8x32xf32> to vector<1x8x32xf32>
    %158 = vector.broadcast %157 : vector<1x8x32xf32> to vector<4x8x32xf32>
    %159 = arith.truncf %158 : vector<4x8x32xf32> to vector<4x8x32xbf16>
    "tpu.trace_start"() <{level = 10 : i32, message = "htd,hde->hte"}> : () -> ()
    %cst_73 = arith.constant dense<0.000000e+00> : vector<4x8x24xf32>
    %160 = tpu.matmul %159, %152, %cst_73 {dimension_numbers = #tpu.dot_dimension_numbers<[2], [1], [1], [2], [0, 0, 0, 1, 1, 2], [0], [0]>} : vector<4x8x32xbf16>, vector<4x32x24xbf16>, vector<4x8x24xf32> -> vector<4x8x24xf32>
    "tpu.trace_stop"() : () -> ()
    %161 = vector.broadcast %153 : vector<4x1x24xf32> to vector<4x8x24xf32>
    %162 = arith.addf %160, %161 : vector<4x8x24xf32>
    %163 = vector.extract_strided_slice %162 {offsets = [0, 0, 0], sizes = [4, 8, 8], strides = [1, 1, 1]} : vector<4x8x24xf32> to vector<4x8x8xf32>
    %164 = vector.extract_strided_slice %162 {offsets = [0, 0, 8], sizes = [4, 8, 8], strides = [1, 1, 1]} : vector<4x8x24xf32> to vector<4x8x8xf32>
    %165 = vector.extract_strided_slice %162 {offsets = [0, 0, 16], sizes = [4, 8, 8], strides = [1, 1, 1]} : vector<4x8x24xf32> to vector<4x8x8xf32>
    %166 = arith.truncf %163 : vector<4x8x8xf32> to vector<4x8x8xbf16>
    %167 = arith.truncf %164 : vector<4x8x8xf32> to vector<4x8x8xbf16>
    "tpu.trace_start"() <{level = 10 : i32, message = "hqd,hkd->hqk"}> : () -> ()
    %cst_74 = arith.constant dense<0.000000e+00> : vector<4x8x8xf32>
    %168 = tpu.matmul %166, %167, %cst_74 {dimension_numbers = #tpu.dot_dimension_numbers<[2], [2], [1], [1], [0, 0, 0, 1, 1, 1], [0], [0]>} : vector<4x8x8xbf16>, vector<4x8x8xbf16>, vector<4x8x8xf32> -> vector<4x8x8xf32>
    "tpu.trace_stop"() : () -> ()
    %cst_75 = arith.constant 0.353553385 : f32
    %169 = vector.broadcast %cst_75 : f32 to vector<4x8x8xf32>
    %170 = arith.mulf %168, %169 : vector<4x8x8xf32>
    %171 = vector.extract_strided_slice %6 {offsets = [0, 0, 0], sizes = [1, 8, 8], strides = [1, 1, 1]} : vector<2x8x8xf32> to vector<1x8x8xf32>
    %172 = vector.shape_cast %171 : vector<1x8x8xf32> to vector<8x8xf32>
    %173 = vector.shape_cast %172 : vector<8x8xf32> to vector<1x8x8xf32>
    %174 = vector.broadcast %173 : vector<1x8x8xf32> to vector<4x8x8xf32>
    %175 = arith.addf %170, %174 : vector<4x8x8xf32>
    %cst_76 = arith.constant dense<0xFF800000> : vector<4x8xf32>
    %176 = vector.multi_reduction <maximumf>, %175, %cst_76 [2] : vector<4x8x8xf32> to vector<4x8xf32>
    %177 = vector.shape_cast %176 : vector<4x8xf32> to vector<4x8x1xf32>
    %178 = vector.broadcast %177 : vector<4x8x1xf32> to vector<4x8x8xf32>
    %179 = arith.subf %175, %178 : vector<4x8x8xf32>
    %180 = math.exp %179 : vector<4x8x8xf32>
    %cst_77 = arith.constant dense<0.000000e+00> : vector<4x8xf32>
    %181 = vector.multi_reduction <add>, %180, %cst_77 [2] : vector<4x8x8xf32> to vector<4x8xf32>
    %182 = vector.shape_cast %181 : vector<4x8xf32> to vector<4x8x1xf32>
    %183 = tpu.reciprocal %182 {approx = true} : vector<4x8x1xf32> -> vector<4x8x1xf32>
    %184 = vector.broadcast %183 : vector<4x8x1xf32> to vector<4x8x8xf32>
    %185 = arith.mulf %180, %184 : vector<4x8x8xf32>
    %186 = arith.truncf %185 : vector<4x8x8xf32> to vector<4x8x8xbf16>
    %187 = arith.truncf %165 : vector<4x8x8xf32> to vector<4x8x8xbf16>
    "tpu.trace_start"() <{level = 10 : i32, message = "hqk,hkd->hqd"}> : () -> ()
    %cst_78 = arith.constant dense<0.000000e+00> : vector<4x8x8xf32>
    %188 = tpu.matmul %186, %187, %cst_78 {dimension_numbers = #tpu.dot_dimension_numbers<[2], [1], [1], [2], [0, 0, 0, 1, 1, 2], [0], [0]>} : vector<4x8x8xbf16>, vector<4x8x8xbf16>, vector<4x8x8xf32> -> vector<4x8x8xf32>
    "tpu.trace_stop"() : () -> ()
    %189 = arith.truncf %188 : vector<4x8x8xf32> to vector<4x8x8xbf16>
    "tpu.trace_start"() <{level = 10 : i32, message = "hqd,hde->hqe"}> : () -> ()
    %cst_79 = arith.constant dense<0.000000e+00> : vector<4x8x32xf32>
    %190 = tpu.matmul %189, %154, %cst_79 {dimension_numbers = #tpu.dot_dimension_numbers<[2], [1], [1], [2], [0, 0, 0, 1, 1, 2], [0], [0]>} : vector<4x8x8xbf16>, vector<4x8x32xbf16>, vector<4x8x32xf32> -> vector<4x8x32xf32>
    "tpu.trace_stop"() : () -> ()
    %cst_80 = arith.constant dense<0.000000e+00> : vector<8x32xf32>
    %191 = vector.multi_reduction <add>, %190, %cst_80 [0] : vector<4x8x32xf32> to vector<8x32xf32>
    %192 = vector.extract_strided_slice %151 {offsets = [8, 0], sizes = [8, 32], strides = [1, 1]} : vector<16x32xf32> to vector<8x32xf32>
    %193 = vector.shape_cast %192 : vector<8x32xf32> to vector<1x8x32xf32>
    %194 = vector.shape_cast %193 : vector<1x8x32xf32> to vector<1x8x32xf32>
    %195 = vector.broadcast %194 : vector<1x8x32xf32> to vector<4x8x32xf32>
    %196 = arith.truncf %195 : vector<4x8x32xf32> to vector<4x8x32xbf16>
    "tpu.trace_start"() <{level = 10 : i32, message = "htd,hde->hte"}> : () -> ()
    %cst_81 = arith.constant dense<0.000000e+00> : vector<4x8x24xf32>
    %197 = tpu.matmul %196, %152, %cst_81 {dimension_numbers = #tpu.dot_dimension_numbers<[2], [1], [1], [2], [0, 0, 0, 1, 1, 2], [0], [0]>} : vector<4x8x32xbf16>, vector<4x32x24xbf16>, vector<4x8x24xf32> -> vector<4x8x24xf32>
    "tpu.trace_stop"() : () -> ()
    %198 = vector.broadcast %153 : vector<4x1x24xf32> to vector<4x8x24xf32>
    %199 = arith.addf %197, %198 : vector<4x8x24xf32>
    %200 = vector.extract_strided_slice %199 {offsets = [0, 0, 0], sizes = [4, 8, 8], strides = [1, 1, 1]} : vector<4x8x24xf32> to vector<4x8x8xf32>
    %201 = vector.extract_strided_slice %199 {offsets = [0, 0, 8], sizes = [4, 8, 8], strides = [1, 1, 1]} : vector<4x8x24xf32> to vector<4x8x8xf32>
    %202 = vector.extract_strided_slice %199 {offsets = [0, 0, 16], sizes = [4, 8, 8], strides = [1, 1, 1]} : vector<4x8x24xf32> to vector<4x8x8xf32>
    %203 = arith.truncf %200 : vector<4x8x8xf32> to vector<4x8x8xbf16>
    %204 = arith.truncf %201 : vector<4x8x8xf32> to vector<4x8x8xbf16>
    "tpu.trace_start"() <{level = 10 : i32, message = "hqd,hkd->hqk"}> : () -> ()
    %cst_82 = arith.constant dense<0.000000e+00> : vector<4x8x8xf32>
    %205 = tpu.matmul %203, %204, %cst_82 {dimension_numbers = #tpu.dot_dimension_numbers<[2], [2], [1], [1], [0, 0, 0, 1, 1, 1], [0], [0]>} : vector<4x8x8xbf16>, vector<4x8x8xbf16>, vector<4x8x8xf32> -> vector<4x8x8xf32>
    "tpu.trace_stop"() : () -> ()
    %cst_83 = arith.constant 0.353553385 : f32
    %206 = vector.broadcast %cst_83 : f32 to vector<4x8x8xf32>
    %207 = arith.mulf %205, %206 : vector<4x8x8xf32>
    %208 = vector.extract_strided_slice %6 {offsets = [1, 0, 0], sizes = [1, 8, 8], strides = [1, 1, 1]} : vector<2x8x8xf32> to vector<1x8x8xf32>
    %209 = vector.shape_cast %208 : vector<1x8x8xf32> to vector<8x8xf32>
    %210 = vector.shape_cast %209 : vector<8x8xf32> to vector<1x8x8xf32>
    %211 = vector.broadcast %210 : vector<1x8x8xf32> to vector<4x8x8xf32>
    %212 = arith.addf %207, %211 : vector<4x8x8xf32>
    %cst_84 = arith.constant dense<0xFF800000> : vector<4x8xf32>
    %213 = vector.multi_reduction <maximumf>, %212, %cst_84 [2] : vector<4x8x8xf32> to vector<4x8xf32>
    %214 = vector.shape_cast %213 : vector<4x8xf32> to vector<4x8x1xf32>
    %215 = vector.broadcast %214 : vector<4x8x1xf32> to vector<4x8x8xf32>
    %216 = arith.subf %212, %215 : vector<4x8x8xf32>
    %217 = math.exp %216 : vector<4x8x8xf32>
    %cst_85 = arith.constant dense<0.000000e+00> : vector<4x8xf32>
    %218 = vector.multi_reduction <add>, %217, %cst_85 [2] : vector<4x8x8xf32> to vector<4x8xf32>
    %219 = vector.shape_cast %218 : vector<4x8xf32> to vector<4x8x1xf32>
    %220 = tpu.reciprocal %219 {approx = true} : vector<4x8x1xf32> -> vector<4x8x1xf32>
    %221 = vector.broadcast %220 : vector<4x8x1xf32> to vector<4x8x8xf32>
    %222 = arith.mulf %217, %221 : vector<4x8x8xf32>
    %223 = arith.truncf %222 : vector<4x8x8xf32> to vector<4x8x8xbf16>
    %224 = arith.truncf %202 : vector<4x8x8xf32> to vector<4x8x8xbf16>
    "tpu.trace_start"() <{level = 10 : i32, message = "hqk,hkd->hqd"}> : () -> ()
    %cst_86 = arith.constant dense<0.000000e+00> : vector<4x8x8xf32>
    %225 = tpu.matmul %223, %224, %cst_86 {dimension_numbers = #tpu.dot_dimension_numbers<[2], [1], [1], [2], [0, 0, 0, 1, 1, 2], [0], [0]>} : vector<4x8x8xbf16>, vector<4x8x8xbf16>, vector<4x8x8xf32> -> vector<4x8x8xf32>
    "tpu.trace_stop"() : () -> ()
    %226 = arith.truncf %225 : vector<4x8x8xf32> to vector<4x8x8xbf16>
    "tpu.trace_start"() <{level = 10 : i32, message = "hqd,hde->hqe"}> : () -> ()
    %cst_87 = arith.constant dense<0.000000e+00> : vector<4x8x32xf32>
    %227 = tpu.matmul %226, %154, %cst_87 {dimension_numbers = #tpu.dot_dimension_numbers<[2], [1], [1], [2], [0, 0, 0, 1, 1, 2], [0], [0]>} : vector<4x8x8xbf16>, vector<4x8x32xbf16>, vector<4x8x32xf32> -> vector<4x8x32xf32>
    "tpu.trace_stop"() : () -> ()
    %cst_88 = arith.constant dense<0.000000e+00> : vector<8x32xf32>
    %228 = vector.multi_reduction <add>, %227, %cst_88 [0] : vector<4x8x32xf32> to vector<8x32xf32>
    %229 = tpu.concatenate %191, %228 in 0 : vector<8x32xf32>, vector<8x32xf32> -> vector<16x32xf32>
    %c0_89 = arith.constant 0 : index
    %c0_90 = arith.constant 0 : index
    %230 = vector.load %arg20[%c0_89, %c0_90] : memref<1x32xf32, #tpu.memory_space<vmem>>, vector<1x32xf32>
    %231 = vector.broadcast %230 : vector<1x32xf32> to vector<16x32xf32>
    %232 = arith.addf %229, %231 : vector<16x32xf32>
    %233 = arith.addf %151, %232 : vector<16x32xf32>
    %c0_91 = arith.constant 0 : index
    %c0_92 = arith.constant 0 : index
    %234 = vector.load %arg21[%c0_91, %c0_92] : memref<1x32xf32, #tpu.memory_space<vmem>>, vector<1x32xf32>
    %c0_93 = arith.constant 0 : index
    %c0_94 = arith.constant 0 : index
    %235 = vector.load %arg22[%c0_93, %c0_94] : memref<1x32xf32, #tpu.memory_space<vmem>>, vector<1x32xf32>
    %cst_95 = arith.constant dense<0.000000e+00> : vector<16xf32>
    %236 = vector.multi_reduction <add>, %233, %cst_95 [1] : vector<16x32xf32> to vector<16xf32>
    %237 = vector.shape_cast %236 : vector<16xf32> to vector<16x1xf32>
    %cst_96 = arith.constant 3.200000e+01 : f32
    %238 = vector.broadcast %cst_96 : f32 to vector<16x1xf32>
    %239 = arith.divf %237, %238 : vector<16x1xf32>
    %240 = vector.broadcast %239 : vector<16x1xf32> to vector<16x32xf32>
    %241 = arith.subf %233, %240 : vector<16x32xf32>
    %242 = arith.mulf %241, %241 : vector<16x32xf32>
    %cst_97 = arith.constant dense<0.000000e+00> : vector<16xf32>
    %243 = vector.multi_reduction <add>, %242, %cst_97 [1] : vector<16x32xf32> to vector<16xf32>
    %244 = vector.shape_cast %243 : vector<16xf32> to vector<16x1xf32>
    %cst_98 = arith.constant 3.200000e+01 : f32
    %245 = vector.broadcast %cst_98 : f32 to vector<16x1xf32>
    %246 = arith.divf %244, %245 : vector<16x1xf32>
    %247 = vector.broadcast %239 : vector<16x1xf32> to vector<16x32xf32>
    %248 = arith.subf %233, %247 : vector<16x32xf32>
    %cst_99 = arith.constant 9.99999974E-6 : f32
    %249 = vector.broadcast %cst_99 : f32 to vector<16x1xf32>
    %250 = arith.addf %246, %249 : vector<16x1xf32>
    %251 = math.rsqrt %250 : vector<16x1xf32>
    %252 = vector.broadcast %251 : vector<16x1xf32> to vector<16x32xf32>
    %253 = arith.mulf %248, %252 : vector<16x32xf32>
    %254 = vector.broadcast %234 : vector<1x32xf32> to vector<16x32xf32>
    %255 = arith.mulf %253, %254 : vector<16x32xf32>
    %256 = vector.broadcast %235 : vector<1x32xf32> to vector<16x32xf32>
    %257 = arith.addf %255, %256 : vector<16x32xf32>
    %c0_100 = arith.constant 0 : index
    %c0_101 = arith.constant 0 : index
    %258 = vector.load %arg23[%c0_100, %c0_101] : memref<32x64xbf16, #tpu.memory_space<vmem>>, vector<32x64xbf16>
    %259 = arith.truncf %257 : vector<16x32xf32> to vector<16x32xbf16>
    %cst_102 = arith.constant dense<0.000000e+00> : vector<16x64xf32>
    %260 = tpu.matmul %259, %258, %cst_102 {dimension_numbers = #tpu.dot_dimension_numbers<[1], [0], [0], [1], [0, 0, 1, 1], [], []>} : vector<16x32xbf16>, vector<32x64xbf16>, vector<16x64xf32> -> vector<16x64xf32>
    %c0_103 = arith.constant 0 : index
    %c0_104 = arith.constant 0 : index
    %261 = vector.load %arg24[%c0_103, %c0_104] : memref<1x64xf32, #tpu.memory_space<vmem>>, vector<1x64xf32>
    %262 = vector.broadcast %261 : vector<1x64xf32> to vector<16x64xf32>
    %263 = arith.addf %260, %262 : vector<16x64xf32>
    %cst_105 = arith.constant 0.000000e+00 : f32
    %264 = vector.broadcast %cst_105 : f32 to vector<16x64xf32>
    %265 = arith.maximumf %263, %264 : vector<16x64xf32>
    %c0_106 = arith.constant 0 : index
    %c0_107 = arith.constant 0 : index
    %266 = vector.load %arg25[%c0_106, %c0_107] : memref<64x32xbf16, #tpu.memory_space<vmem>>, vector<64x32xbf16>
    %267 = arith.truncf %265 : vector<16x64xf32> to vector<16x64xbf16>
    %cst_108 = arith.constant dense<0.000000e+00> : vector<16x32xf32>
    %268 = tpu.matmul %267, %266, %cst_108 {dimension_numbers = #tpu.dot_dimension_numbers<[1], [0], [0], [1], [0, 0, 1, 1], [], []>} : vector<16x64xbf16>, vector<64x32xbf16>, vector<16x32xf32> -> vector<16x32xf32>
    %c0_109 = arith.constant 0 : index
    %c0_110 = arith.constant 0 : index
    %269 = vector.load %arg26[%c0_109, %c0_110] : memref<1x32xf32, #tpu.memory_space<vmem>>, vector<1x32xf32>
    %270 = vector.broadcast %269 : vector<1x32xf32> to vector<16x32xf32>
    %271 = arith.addf %268, %270 : vector<16x32xf32>
    %272 = arith.addf %257, %271 : vector<16x32xf32>
    %c0_111 = arith.constant 0 : index
    %c0_112 = arith.constant 0 : index
    %273 = vector.load %arg27[%c0_111, %c0_112] : memref<1x32xf32, #tpu.memory_space<vmem>>, vector<1x32xf32>
    %c0_113 = arith.constant 0 : index
    %c0_114 = arith.constant 0 : index
    %274 = vector.load %arg28[%c0_113, %c0_114] : memref<1x32xf32, #tpu.memory_space<vmem>>, vector<1x32xf32>
    %cst_115 = arith.constant dense<0.000000e+00> : vector<16xf32>
    %275 = vector.multi_reduction <add>, %272, %cst_115 [1] : vector<16x32xf32> to vector<16xf32>
    %276 = vector.shape_cast %275 : vector<16xf32> to vector<16x1xf32>
    %cst_116 = arith.constant 3.200000e+01 : f32
    %277 = vector.broadcast %cst_116 : f32 to vector<16x1xf32>
    %278 = arith.divf %276, %277 : vector<16x1xf32>
    %279 = vector.broadcast %278 : vector<16x1xf32> to vector<16x32xf32>
    %280 = arith.subf %272, %279 : vector<16x32xf32>
    %281 = arith.mulf %280, %280 : vector<16x32xf32>
    %cst_117 = arith.constant dense<0.000000e+00> : vector<16xf32>
    %282 = vector.multi_reduction <add>, %281, %cst_117 [1] : vector<16x32xf32> to vector<16xf32>
    %283 = vector.shape_cast %282 : vector<16xf32> to vector<16x1xf32>
    %cst_118 = arith.constant 3.200000e+01 : f32
    %284 = vector.broadcast %cst_118 : f32 to vector<16x1xf32>
    %285 = arith.divf %283, %284 : vector<16x1xf32>
    %286 = vector.broadcast %278 : vector<16x1xf32> to vector<16x32xf32>
    %287 = arith.subf %272, %286 : vector<16x32xf32>
    %cst_119 = arith.constant 9.99999974E-6 : f32
    %288 = vector.broadcast %cst_119 : f32 to vector<16x1xf32>
    %289 = arith.addf %285, %288 : vector<16x1xf32>
    %290 = math.rsqrt %289 : vector<16x1xf32>
    %291 = vector.broadcast %290 : vector<16x1xf32> to vector<16x32xf32>
    %292 = arith.mulf %287, %291 : vector<16x32xf32>
    %293 = vector.broadcast %273 : vector<1x32xf32> to vector<16x32xf32>
    %294 = arith.mulf %292, %293 : vector<16x32xf32>
    %295 = vector.broadcast %274 : vector<1x32xf32> to vector<16x32xf32>
    %296 = arith.addf %294, %295 : vector<16x32xf32>
    %c0_120 = arith.constant 0 : index
    %c0_121 = arith.constant 0 : index
    %297 = vector.load %arg3[%c0_120, %c0_121] : memref<2x16xf32, #tpu.memory_space<vmem>>, vector<2x16xf32>
    %cst_122 = arith.constant dense<0.000000e+00> : vector<2x32xf32>
    %298 = tpu.matmul %297, %296, %cst_122 {dimension_numbers = #tpu.dot_dimension_numbers<[1], [0], [0], [1], [0, 0, 1, 1], [], []>} : vector<2x16xf32>, vector<16x32xf32>, vector<2x32xf32> -> vector<2x32xf32>
    %c0_123 = arith.constant 0 : index
    %c0_124 = arith.constant 0 : index
    %299 = vector.load %arg29[%c0_123, %c0_124] : memref<2x32xf32, #tpu.memory_space<vmem>>, vector<2x32xf32>
    tpu.vector_store %arg29[%c0_123, %c0_124], %298 {strides = array<i32>} : memref<2x32xf32, #tpu.memory_space<vmem>>, vector<2x32xf32>,
    return
  }
}

</mosaic_0001>

<bundles_post_ra>
// kernel: tpu_custom_call.1
= control target key start
LH: loop header
LB: loop body
LE: loop exit
PB: predicated region body
PF: predicated region fallthrough
CT: control target
= control target key end

     0   :  { %s5142_s6 = smov 1   ;;  %s5143_s10 = smov 2   ;;  %s6113_s0 = inlined_call_operand.smem [shape: u32[30], index: -1, kind: input, shape index: {}] }
   0x1   :  { %s5185_s5 = sld [smem:[%s6113_s0]]   ;;  %s5144_s14 = smov 3  }
   0x2   :  { %s5190_s9 = sld [smem:[%s6113_s0 + %s5142_s6]]   ;;  %s5145_s18 = smov 4  }
   0x3   :  { %s5195_s13 = sld [smem:[%s6113_s0 + %s5143_s10]]   ;;  %s5146_s22 = smov 5  }
   0x4   :  { %s5200_s17 = sld [smem:[%s6113_s0 + %s5144_s14]]   ;;  %s5147_s26 = smov 6  }
   0x5   :  { %s5205_s21 = sld [smem:[%s6113_s0 + %s5145_s18]]   ;;  %s5148_s30 = smov 7  }
   0x6   :  { %s5210_s25 = sld [smem:[%s6113_s0 + %s5146_s22]]   ;;  %s5149_s4 = smov 8  }
   0x7   :  { %s5215_s29 = sld [smem:[%s6113_s0 + %s5147_s26]]   ;;  %s5150_s10 = smov 9  }
   0x8   :  { %s5220_s3 = sld [smem:[%s6113_s0 + %s5148_s30]]   ;;  %s5151_s15 = smov 10  }
   0x9   :  { %s5225_s8 = sld [smem:[%s6113_s0 + %s5149_s4]]   ;;  %s5152_s20 = smov 11  }
   0xa   :  { %6119 = sst [smem:[#allocation5_spill]] %s5200_s17  ;;  %s5153_s26 = smov 12  }
   0xb   :  { %s5230_s14 = sld [smem:[%s6113_s0 + %s5150_s10]]   ;;  %s5154_s1 = smov 13  }
   0xc   :  { %s5235_s19 = sld [smem:[%s6113_s0 + %s5151_s15]]   ;;  %s5155_s7 = smov 14  }
   0xd   :  { %s5240_s24 = sld [smem:[%s6113_s0 + %s5152_s20]]   ;;  %s5156_s15 = smov 15  }
   0xe   :  { %s5245_s30 = sld [smem:[%s6113_s0 + %s5153_s26]]   ;;  %s5157_s22 = smov 16  }
   0xf   :  { %s5250_s6 = sld [smem:[%s6113_s0 + %s5154_s1]]   ;;  %s5158_s28 = smov 17  }
  0x10   :  { %s5255_s12 = sld [smem:[%s6113_s0 + %s5155_s7]]   ;;  %s5159_s7 = smov 18  }
  0x11   :  { %s5260_s20 = sld [smem:[%s6113_s0 + %s5156_s15]]   ;;  %s5160_s15 = smov 19  }
  0x12   :  { %s5265_s27 = sld [smem:[%s6113_s0 + %s5157_s22]]   ;;  %s5161_s22 = smov 20  }
  0x13   :  { %s5270_s4 = sld [smem:[%s6113_s0 + %s5158_s28]]   ;;  %s5162_s28 = smov 21  }
  0x14   :  { %s5275_s17 = sld [smem:[%s6113_s0 + %s5159_s7]]   ;;  %s5163_s7 = smov 22  }
  0x17   :  { %6120 = sst [smem:[#allocation6_spill]] %s5260_s20 }
  0x18   :  { %6121 = sst [smem:[#allocation7_spill]] %s5265_s27 }
  0x19   :  { %6122 = sst [smem:[#allocation8_spill]] %s5270_s4 }
  0x1a   :  { %6123 = sst [smem:[#allocation9_spill]] %s5275_s17 }
  0x1b   :  { %s5280_s20 = sld [smem:[%s6113_s0 + %s5160_s15]]   ;;  %s5164_s15 = smov 23  }
  0x1c   :  { %s5285_s27 = sld [smem:[%s6113_s0 + %s5161_s22]]   ;;  %s5165_s22 = smov 24  }
  0x1d   :  { %s5290_s4 = sld [smem:[%s6113_s0 + %s5162_s28]]   ;;  %s5166_s28 = smov 25  }
  0x1e   :  { %s5295_s17 = sld [smem:[%s6113_s0 + %s5163_s7]]   ;;  %s5167_s7 = smov 26  }
  0x21   :  { %6124 = sst [smem:[#allocation10_spill]] %s5280_s20 }
  0x22   :  { %6125 = sst [smem:[#allocation11_spill]] %s5285_s27 }
  0x23   :  { %6126 = sst [smem:[#allocation12_spill]] %s5290_s4 }
  0x24   :  { %6127 = sst [smem:[#allocation13_spill]] %s5295_s17 }
  0x25   :  { %s5300_s20 = sld [smem:[%s6113_s0 + %s5164_s15]]   ;;  %s5168_s15 = smov 27  }
  0x26   :  { %s5305_s27 = sld [smem:[%s6113_s0 + %s5165_s22]]   ;;  %s5169_s22 = smov 28  }
  0x27   :  { %s5310_s4 = sld [smem:[%s6113_s0 + %s5166_s28]]   ;;  %s5170_s28 = smov 29  }
  0x28   :  { %s5315_s17 = sld [smem:[%s6113_s0 + %s5167_s7]]  }
  0x2b   :  { %6128 = sst [smem:[#allocation14_spill]] %s5300_s20 }
  0x2c   :  { %6129 = sst [smem:[#allocation15_spill]] %s5305_s27 }
  0x2d   :  { %6130 = sst [smem:[#allocation16_spill]] %s5310_s4 }
  0x2e   :  { %s5320_s20 = sld [smem:[%s6113_s0 + %s5168_s15]]  }
  0x2f   :  { %s5325_s27 = sld [smem:[%s6113_s0 + %s5169_s22]]  }
  0x30   :  { %s5330_s4 = sld [smem:[%s6113_s0 + %s5170_s28]]  }
  0x31   :  { %v5007_v0 = vld [vmem:[%s5205_s21] sm:$0xff]   ;;  %v5171_v1 = vmov 0.0   ;;  %v125_v3 = vld [vmem:[%s5185_s5 + $0x8] sm:$0xff]  ;;  %vm5172_vm0 = vmmov 0   ;;  %vm137_vm1 = vcmask 130048   ;;  %v5344_v6 = vld [vmem:[%s5210_s25 + $0x10] sm:$0xff]  }
  0x32   :  { %4500 = vmatprep.subr.bf16.mxu0 %v5171_v1  ;;  %v124_v2 = vld [vmem:[%s5185_s5] sm:$0xff]  ;;  %4506 = vmatprep.subr.bf16.mxu1 %v5171_v1 }
  0x33   :  { %4501 = vmatpush3.bf16.msra.mxu0 %v5007_v0  ;;  %4502 = vmatprep.mubr.msk.bf16.mxu0 %vm5172_vm0, %v5171_v1  ;;  %v128_v4 = vpack.c.bf16 %v125_v3, %v124_v2  ;;  %v5340_v5 = vld [vmem:[%s5210_s25] sm:$0xff]  }
  0x34   :  { %4514 = vmatprep.subr.bf16.mxu0 %v5171_v1  ;;  %4510 = vmatprep.mubr.msk.bf16.mxu1 %vm5172_vm0, %v5171_v1 }
  0x35   :  { %4507 = vmatpush3.bf16.msra.mxu1 %v5340_v5 }
  0x36   :  { %4503 = vmatmul.mubr.msk.bf16.vlgmr.msra.gmra.mrb[0].mxu0 %vm137_vm1, %v128_v4  ;;  %4508 = vmatprep.subr.bf16.mxu1 %v5171_v1 }
  0x37   :  { %4515 = vmatpush3.bf16.msra.mxu0 %v5344_v6  ;;  %4518 = vmatprep.mubr.msk.bf16.mxu0 %vm5172_vm0, %v5171_v1 }
  0x38   :  { %4516 = vmatprep.subr.bf16.mxu0 %v5171_v1 }
  0x39   :  { %64 = vsyncpa [#allocation3], 0  ;;  %v5356_v7 = vld [vmem:[%s5210_s25 + $0x8] sm:$0xff]   ;;  %v5359_v8 = vld [vmem:[%s5210_s25 + $0x18] sm:$0xff]   ;;  %vm245_vm2 = vcmask 261120   ;;  %s5173_s0 = smov 120  }
  0x3a   :  { %4509 = vmatpush3.bf16.msra.mxu1 %v5356_v7  ;;  %v129_v9 = vld [vmem:[%s5190_s9] sm:$0xff]  ;;  %v5374_v15 = vld [vmem:[%s5210_s25 + $0x30] sm:$0xff]   ;;  %v5383_v18 = vld [vmem:[%s5210_s25 + $0x28] sm:$0xff]   ;;  %vm452_vm3 = vcmask 64512   ;;  %s5174_s5 = smov 112   ;;  %vm707_vm4 = vcmask 1043456  }
  0x3b   :  { %4517 = vmatpush3.bf16.msra.mxu0 %v5359_v8  ;;  %4522 = vmatprep.subr.bf16.mxu1 %v5171_v1  ;;  %v5371_v14 = vld [vmem:[%s5210_s25 + $0x20] sm:$0xff]   ;;  %v5386_v19 = vld [vmem:[%s5210_s25 + $0x38] sm:$0xff]   ;;  %vm2051_vm5 = vcmask 523264   ;;  %s6132_s21 = sld [smem:[#allocation6_spill]]  ;;  %s6133_s25 = sld [smem:[#allocation7_spill]]  ;;  %vm4169_vm6 = vcmask 254976  }
  0x3c   :  { %4530 = vmatprep.subr.bf16.mxu0 %v5171_v1  ;;  %v5405_v20 = vld [vmem:[%s5215_s29] ss:$0 sm:$0xff]  ;;  %v5408_v22 = vld [vmem:[%s5215_s29 + $0x1] ss:$0 sm:$0xff]  ;;  %v5417_v33 = vld [vmem:[%s5215_s29 + $0x2] ss:$0 sm:$0xff] }
  0x3d   :  { %v5422_v36 = vld [vmem:[%s5215_s29 + $0x3] ss:$0 sm:$0xff]  ;;  %s6134_s29 = sld [smem:[#allocation9_spill]] }
  0x3e   :  { %v182_v57 = vld [vmem:[%s5195_s13] sm:$0xff] }
 0x109   :  { %v175_v10 = vpop.f32.mrb[0].mxu0 }
 0x10a   :  { %v5366_v11 = vadd.f32 %v175_v10, %v129_v9  ;;  %v4504_v12 = vpop.f32.mrb[1].mxu0 }
 0x10b   :  { %v5368_v13 = vpop.f32.mrb[2].mxu0 }
 0x10c   :  { %v208_v16 = vpack.c.bf16 %v5366_v11, %v5366_v11  ;;  %v4505_v17 = vpop.f32.mrb[3].mxu0 }
 0x10e   :  { %4511 = vmatmul.mubr.msk.bf16.vlgmr.msra.gmra.mrb[0].mxu1 %vm245_vm2, %v208_v16  ;;  %4519 = vmatmul.mubr.msk.bf16.vlgmr.msra.gmra.mrb[4].mxu0 %vm245_vm2, %v208_v16 }
 0x10f   :  { %4523 = vmatpush3.bf16.msra.mxu1 %v5371_v14  ;;  %4531 = vmatpush3.bf16.msra.mxu0 %v5374_v15 }
 0x110   :  { %4524 = vmatprep.subr.bf16.mxu1 %v5171_v1  ;;  %4532 = vmatprep.subr.bf16.mxu0 %v5171_v1 }
 0x111   :  { %4526 = vmatprep.mubr.msk.bf16.mxu1 %vm5172_vm0, %v5171_v1  ;;  %4534 = vmatprep.mubr.msk.bf16.mxu0 %vm5172_vm0, %v5171_v1 }
 0x113   :  { %4525 = vmatpush3.bf16.msra.mxu1 %v5383_v18  ;;  %4533 = vmatpush3.bf16.msra.mxu0 %v5386_v19 }
 0x114   :  { %4538 = vmatprep.subr.bf16.mxu1 %v5171_v1  ;;  %4544 = vmatprep.subr.bf16.mxu0 %v5171_v1 }
 0x116   :  { %4527 = vmatmul.mubr.msk.bf16.vlgmr.msra.gmra.mrb[4].mxu1 %vm245_vm2, %v208_v16  ;;  %4535 = vmatmul.mubr.msk.bf16.vlgmr.msra.gmra.mrb[8].mxu0 %vm245_vm2, %v208_v16 }
 0x117   :  { %4540 = vmatprep.mubr.msk.bf16.mxu1 %vm5172_vm0, %v5171_v1  ;;  %4546 = vmatprep.mubr.msk.bf16.mxu0 %vm5172_vm0, %v5171_v1 }
 0x1e1   :  { %v283_v21 = vpop.f32.mrb[0].mxu1  ;;  %v335_v23 = vpop.f32.mrb[4].mxu0 }
 0x1e2   :  { %v284_v24 = vadd.f32 %v5405_v20, %v283_v21  ;;  %v4512_v25 = vpop.f32.mrb[1].mxu1  ;;  %v4520_v26 = vpop.f32.mrb[5].mxu0  ;;  %v336_v30 = vadd.f32 %v5408_v22, %v335_v23 }
 0x1e3   :  { %v286_v27 = vpop.f32.mrb[2].mxu1  ;;  %v338_v28 = vpop.f32.mrb[6].mxu0 }
 0x1e4   :  { %v5411_v29 = vpack.c.bf16 %v284_v24, %v284_v24  ;;  %v4513_v31 = vpop.f32.mrb[3].mxu1  ;;  %v4521_v32 = vpop.f32.mrb[7].mxu0  ;;  %v5419_v34 = vpack.c.bf16 %v336_v30, %v336_v30 }
 0x1e6   :  { %450 = vrot.lane.b32.xlu0 %v5411_v29, %s5173_s0 }
 0x1e9   :  { %v387_v35 = vpop.f32.mrb[4].mxu1  ;;  %v439_v37 = vpop.f32.mrb[8].mxu0 }
 0x1ea   :  { %v388_v38 = vadd.f32 %v5417_v33, %v387_v35  ;;  %v4528_v39 = vpop.f32.mrb[5].mxu1  ;;  %500 = vrot.lane.b32.xlu0 %v5419_v34, %s5173_s0  ;;  %v4536_v40 = vpop.f32.mrb[9].mxu0  ;;  %v440_v44 = vadd.f32 %v5422_v36, %v439_v37 }
 0x1eb   :  { %v390_v41 = vpop.f32.mrb[6].mxu1  ;;  %v442_v42 = vpop.f32.mrb[10].mxu0 }
 0x1ec   :  { %v5427_v43 = vpack.c.bf16 %v388_v38, %v388_v38  ;;  %v4529_v45 = vpop.f32.mrb[7].mxu1  ;;  %v4537_v46 = vpop.f32.mrb[11].mxu0  ;;  %v5432_v47 = vpack.c.bf16 %v440_v44, %v440_v44 }
 0x1ee   :  { %549 = vrot.lane.b32.xlu1 %v5427_v43, %s5173_s0 }
 0x1f2   :  { %598 = vrot.lane.b32.xlu1 %v5432_v47, %s5173_s0 }
 0x258   :  { %v451_v48 = vpop.permute.xlu0 %450 }
 0x259   :  { %v457_v49 = vsel %vm452_vm3, %v451_v48, 0 }
 0x25a   :  { %4539 = vmatpush3.bf16.xpose.msra.mxu1 %v457_v49 }
 0x25b   :  { %4550 = vmatprep.subr.bf16.mxu1 %v5171_v1 }
 0x25c   :  { %v501_v50 = vpop.permute.xlu0 %500 }
 0x25d   :  { %v506_v51 = vsel %vm452_vm3, %v501_v50, 0 }
 0x25e   :  { %4545 = vmatpush3.bf16.xpose.msra.mxu0 %v506_v51 }
 0x25f   :  { %4556 = vmatprep.subr.bf16.mxu0 %v5171_v1 }
 0x260   :  { %v550_v52 = vpop.permute.xlu1 %549 }
 0x261   :  { %v555_v53 = vsel %vm452_vm3, %v550_v52, 0  ;;  %4541 = vmatmul.mubr.msk.bf16.vlgmr.msra.gmra.mrb[8].mxu1 %vm452_vm3, %v5411_v29 }
 0x262   :  { %4551 = vmatpush3.bf16.xpose.msra.mxu1 %v555_v53  ;;  %4552 = vmatprep.mubr.msk.bf16.mxu1 %vm5172_vm0, %v5171_v1 }
 0x263   :  { %4562 = vmatprep.subr.bf16.mxu1 %v5171_v1 }
 0x264   :  { %v599_v54 = vpop.permute.xlu1 %598 }
 0x265   :  { %v604_v55 = vsel %vm452_vm3, %v599_v54, 0  ;;  %4547 = vmatmul.mubr.msk.bf16.vlgmr.msra.gmra.mrb[12].mxu0 %vm452_vm3, %v5419_v34 }
 0x266   :  { %4557 = vmatpush3.bf16.xpose.msra.mxu0 %v604_v55  ;;  %4558 = vmatprep.mubr.msk.bf16.mxu0 %vm5172_vm0, %v5171_v1 }
 0x267   :  { %4568 = vmatprep.subr.bf16.mxu0 %v5171_v1 }
 0x269   :  { %4553 = vmatmul.mubr.msk.bf16.vlgmr.msra.gmra.mrb[12].mxu1 %vm452_vm3, %v5427_v43 }
 0x26a   :  { %4564 = vmatprep.mubr.msk.bf16.mxu1 %vm5172_vm0, %v5171_v1 }
 0x26d   :  { %4559 = vmatmul.mubr.msk.bf16.vlgmr.msra.gmra.mrb[16].mxu0 %vm452_vm3, %v5432_v47 }
 0x26e   :  { %4570 = vmatprep.mubr.msk.bf16.mxu0 %vm5172_vm0, %v5171_v1 }
 0x334   :  { %v493_v56 = vpop.f32.mrb[8].mxu1 }
 0x335   :  { %v646_v58 = vmul.f32 0.35355338, %v493_v56  ;;  %v4542_v59 = vpop.f32.mrb[9].mxu1 }
 0x336   :  { %v496_v60 = vpop.f32.mrb[10].mxu1 }
 0x337   :  { %v4543_v61 = vpop.f32.mrb[11].mxu1  ;;  %v650_v62 = vadd.f32 %v646_v58, %v182_v57 }
 0x338   :  { %v542_v63 = vpop.f32.mrb[12].mxu0 }
 0x339   :  { %v647_v0 = vmul.f32 0.35355338, %v542_v63  ;;  %v4548_v2 = vpop.f32.mrb[13].mxu0  ;;  %v654_v3 = vsel %vm452_vm3, %v650_v62, -inf }
 0x33a   :  { %655 = vmax.xlane.f32.xlu0 %v654_v3  ;;  %v545_v4 = vpop.f32.mrb[14].mxu0 }
 0x33b   :  { %v4549_v9 = vpop.f32.mrb[15].mxu0  ;;  %v651_v10 = vadd.f32 %v647_v0, %v182_v57 }
 0x33c   :  { %v591_v12 = vpop.f32.mrb[12].mxu1 }
 0x33d   :  { %v648_v16 = vmul.f32 0.35355338, %v591_v12  ;;  %v4554_v17 = vpop.f32.mrb[13].mxu1  ;;  %v657_v21 = vsel %vm452_vm3, %v651_v10, -inf }
 0x33e   :  { %v594_v23 = vpop.f32.mrb[14].mxu1  ;;  %658 = vmax.xlane.f32.xlu1 %v657_v21 }
 0x33f   :  { %v4555_v24 = vpop.f32.mrb[15].mxu1  ;;  %v652_v25 = vadd.f32 %v648_v16, %v182_v57 }
 0x340   :  { %v640_v26 = vpop.f32.mrb[16].mxu0 }
 0x341   :  { %v649_v27 = vmul.f32 0.35355338, %v640_v26  ;;  %v4560_v28 = vpop.f32.mrb[17].mxu0  ;;  %v660_v30 = vsel %vm452_vm3, %v652_v25, -inf }
 0x342   :  { %661 = vmax.xlane.f32.xlu0 %v660_v30  ;;  %v643_v31 = vpop.f32.mrb[18].mxu0  ;;  %v204_v30 = vld [vmem:[%s5220_s3] sm:$0xf] }
 0x343   :  { %v4561_v32 = vpop.f32.mrb[19].mxu0  ;;  %v653_v35 = vadd.f32 %v649_v27, %v182_v57  ;;  %v5499_v31 = vsel %vm707_vm4, %v204_v30, 0 }
 0x344   :  { %v205_v32 = vld [vmem:[%s5220_s3 + $0x4] sm:$0xf] }
 0x345   :  { %v663_v37 = vsel %vm452_vm3, %v653_v35, -inf }
 0x346   :  { %664 = vmax.xlane.f32.xlu0 %v663_v37  ;;  %v206_v37 = vld [vmem:[%s5220_s3 + $0x8] sm:$0xf] }
 0x34f   :  { %702 = vrot.lane.b32.xlu1 %v5411_v29, %s5174_s5 }
 0x3c7   :  { %v656_v38 = vpop.xlane.xlu0 %655 }
 0x3c8   :  { %v666_v39 = vsub.f32 %v650_v62, %v656_v38 }
 0x3ca   :  { %v670_v40 = vmul.f32 1.442695, %v666_v39 }
 0x3cb   :  { %v659_v41 = vpop.xlane.xlu1 %658 }
 0x3cc   :  { %5036 = vpow2.f32 %v670_v40  ;;  %v667_v42 = vsub.f32 %v651_v10, %v659_v41  ;;  %v5511_v41 = vsel %vm707_vm4, %v206_v37, 0 }
 0x3ce   :  { %v672_v44 = vmul.f32 1.442695, %v667_v42 }
 0x3cf   :  { %v662_v45 = vpop.xlane.xlu0 %661  ;;  %v703_v46 = vpop.permute.xlu1 %702 }
 0x3d0   :  { %5038 = vpow2.f32 %v672_v44  ;;  %v668_v48 = vsub.f32 %v652_v25, %v662_v45  ;;  %v709_v49 = vsel %vm707_vm4, %v703_v46, 0  ;;  %v207_v45 = vld [vmem:[%s5220_s3 + $0xc] sm:$0xf]  ;;  %s6135_s3 = sld [smem:[#allocation10_spill]] }
 0x3d1   :  { %4563 = vmatpush3.bf16.msra.mxu1 %v709_v49 }
 0x3d2   :  { %v674_v50 = vmul.f32 1.442695, %v668_v48  ;;  %4574 = vmatprep.subr.bf16.mxu1 %v5171_v1 }
 0x3d3   :  { %v665_v51 = vpop.xlane.xlu0 %664 }
 0x3d4   :  { %5040 = vpow2.f32 %v674_v50  ;;  %v669_v29 = vsub.f32 %v653_v35, %v665_v51  ;;  %v5505_v35 = vsel %vm707_vm4, %v205_v32, 0  ;;  %v5520_v50 = vsel %vm707_vm4, %v207_v45, 0 }
 0x3d6   :  { %v5037_v52 = vpop.eup %5036  ;;  %v676_v53 = vmul.f32 1.442695, %v669_v29 }
 0x3d7   :  { %v678_v54 = vsel %vm452_vm3, %v5037_v52, 0.0 }
 0x3d8   :  { %5042 = vpow2.f32 %v676_v53  ;;  %679 = vadd.xlane.f32.xlu1 %v678_v54 }
 0x3da   :  { %v5039_v55 = vpop.eup %5038 }
 0x3db   :  { %v681_v56 = vsel %vm452_vm3, %v5039_v55, 0.0 }
 0x3dc   :  { %682 = vadd.xlane.f32.xlu0 %v681_v56 }
 0x3de   :  { %v5041_v57 = vpop.eup %5040 }
 0x3df   :  { %v684_v58 = vsel %vm452_vm3, %v5041_v57, 0.0 }
 0x3e0   :  { %685 = vadd.xlane.f32.xlu1 %v684_v58 }
 0x3e2   :  { %v5043_v59 = vpop.eup %5042 }
 0x3e3   :  { %v687_v60 = vsel %vm452_vm3, %v5043_v59, 0.0 }
 0x3e4   :  { %688 = vadd.xlane.f32.xlu0 %v687_v60 }
 0x3f1   :  { %799 = vrot.lane.b32.xlu1 %v5427_v43, %s5174_s5 }
 0x3f5   :  { %847 = vrot.lane.b32.xlu1 %v5432_v47, %s5174_s5 }
 0x3fa   :  { %751 = vrot.lane.b32.xlu0 %v5419_v34, %s5174_s5 }
 0x465   :  { %v680_v61 = vpop.xlane.xlu1 %679 }
 0x466   :  { %5044 = vrcp.f32 %v680_v61 }
 0x469   :  { %v683_v62 = vpop.xlane.xlu0 %682 }
 0x46a   :  { %5046 = vrcp.f32 %v683_v62 }
 0x46d   :  { %v686_v63 = vpop.xlane.xlu1 %685 }
 0x46e   :  { %5048 = vrcp.f32 %v686_v63 }
 0x470   :  { %v5045_v0 = vpop.eup %5044 }
 0x471   :  { %v694_v2 = vmul.f32 %v5045_v0, %v5037_v52  ;;  %v800_v3 = vpop.permute.xlu1 %799  ;;  %v689_v4 = vpop.xlane.xlu0 %688 }
 0x472   :  { %5050 = vrcp.f32 %v689_v4  ;;  %v805_v12 = vsel %vm707_vm4, %v800_v3, 0 }
 0x473   :  { %v698_v9 = vpack.c.bf16 %v694_v2, %v694_v2 }
 0x474   :  { %v5047_v10 = vpop.eup %5046 }
 0x475   :  { %v695_v43 = vmul.f32 %v5047_v10, %v5039_v55  ;;  %4565 = vmatmul.mubr.msk.bf16.vlgmr.msra.gmra.mrb[16].mxu1 %vm452_vm3, %v698_v9  ;;  %v752_v47 = vpop.permute.xlu0 %751  ;;  %v848_v16 = vpop.permute.xlu1 %847  ;;  %v130_v55 = vld [vmem:[%s5190_s9 + $0x8] sm:$0xff]  ;;  %s6131_s9 = sld [smem:[#allocation8_spill]] }
 0x476   :  { %4575 = vmatpush3.bf16.msra.mxu1 %v805_v12  ;;  %v757_v34 = vsel %vm707_vm4, %v752_v47, 0  ;;  %4576 = vmatprep.mubr.msk.bf16.mxu1 %vm5172_vm0, %v5171_v1  ;;  %v853_v24 = vsel %vm707_vm4, %v848_v16, 0  ;;  %v5533_v58 = vadd.f32 %v5368_v13, %v130_v55 }
 0x477   :  { %4569 = vmatpush3.bf16.msra.mxu0 %v757_v34  ;;  %v699_v17 = vpack.c.bf16 %v695_v43, %v695_v43  ;;  %4586 = vmatprep.subr.bf16.mxu1 %v5171_v1 }
 0x478   :  { %v5049_v21 = vpop.eup %5048  ;;  %4580 = vmatprep.subr.bf16.mxu0 %v5171_v1 }
 0x479   :  { %v696_v23 = vmul.f32 %v5049_v21, %v5041_v57 }
 0x47a   :  { %4571 = vmatmul.mubr.msk.bf16.vlgmr.msra.gmra.mrb[20].mxu0 %vm452_vm3, %v699_v17 }
 0x47b   :  { %4581 = vmatpush3.bf16.msra.mxu0 %v853_v24  ;;  %v700_v25 = vpack.c.bf16 %v696_v23, %v696_v23  ;;  %4582 = vmatprep.mubr.msk.bf16.mxu0 %vm5172_vm0, %v5171_v1 }
 0x47c   :  { %v5051_v26 = vpop.eup %5050  ;;  %4592 = vmatprep.subr.bf16.mxu0 %v5171_v1 }
 0x47d   :  { %v697_v27 = vmul.f32 %v5051_v26, %v5043_v59  ;;  %4577 = vmatmul.mubr.msk.bf16.vlgmr.msra.gmra.mrb[20].mxu1 %vm452_vm3, %v700_v25 }
 0x47e   :  { %4588 = vmatprep.mubr.msk.bf16.mxu1 %vm5172_vm0, %v5171_v1  ;;  %4587 = vmatpush3.bf16.msra.mxu1 %v5499_v31 }
 0x47f   :  { %v701_v28 = vpack.c.bf16 %v697_v27, %v697_v27  ;;  %4598 = vmatprep.subr.bf16.mxu1 %v5171_v1 }
 0x482   :  { %4583 = vmatmul.mubr.msk.bf16.vlgmr.msra.gmra.mrb[24].mxu0 %vm452_vm3, %v701_v28 }
 0x483   :  { %4594 = vmatprep.mubr.msk.bf16.mxu0 %vm5172_vm0, %v5171_v1  ;;  %4593 = vmatpush3.bf16.msra.mxu0 %v5505_v35 }
 0x484   :  { %4604 = vmatprep.subr.bf16.mxu0 %v5171_v1 }
 0x548   :  { %v745_v38 = vpop.f32.mrb[16].mxu1 }
 0x549   :  { %v895_v39 = vpack.c.bf16 %v745_v38, %v745_v38  ;;  %v4566_v40 = vpop.f32.mrb[17].mxu1 }
 0x54a   :  { %v748_v42 = vpop.f32.mrb[18].mxu1 }
 0x54b   :  { %v4567_v44 = vpop.f32.mrb[19].mxu1  ;;  %4589 = vmatmul.mubr.msk.bf16.vlgmr.msra.gmra.mrb[24].mxu1 %vm452_vm3, %v895_v39 }
 0x54c   :  { %4599 = vmatpush3.bf16.msra.mxu1 %v5511_v41  ;;  %4600 = vmatprep.mubr.msk.bf16.mxu1 %vm5172_vm0, %v5171_v1 }
 0x54d   :  { %v793_v46 = vpop.f32.mrb[20].mxu0  ;;  %4610 = vmatprep.subr.bf16.mxu1 %v5171_v1 }
 0x54e   :  { %v896_v48 = vpack.c.bf16 %v793_v46, %v793_v46  ;;  %v4572_v49 = vpop.f32.mrb[21].mxu0 }
 0x54f   :  { %v796_v51 = vpop.f32.mrb[22].mxu0 }
 0x550   :  { %v4573_v29 = vpop.f32.mrb[23].mxu0  ;;  %v841_v52 = vpop.f32.mrb[20].mxu1  ;;  %4595 = vmatmul.mubr.msk.bf16.vlgmr.msra.gmra.mrb[28].mxu0 %vm452_vm3, %v896_v48 }
 0x551   :  { %v897_v53 = vpack.c.bf16 %v841_v52, %v841_v52  ;;  %v4578_v54 = vpop.f32.mrb[21].mxu1  ;;  %4605 = vmatpush3.bf16.msra.mxu0 %v5520_v50  ;;  %4606 = vmatprep.mubr.msk.bf16.mxu0 %vm5172_vm0, %v5171_v1 }
 0x552   :  { %v844_v56 = vpop.f32.mrb[22].mxu1  ;;  %4618 = vmatprep.subr.bf16.mxu0 %v5171_v1 }
 0x553   :  { %v4579_v57 = vpop.f32.mrb[23].mxu1  ;;  %4601 = vmatmul.mubr.msk.bf16.vlgmr.msra.gmra.mrb[28].mxu1 %vm452_vm3, %v897_v53 }
 0x554   :  { %4611 = vmatpush3.bf16.msra.mxu1 %v5340_v5  ;;  %4614 = vmatprep.mubr.msk.bf16.mxu1 %vm5172_vm0, %v5171_v1  ;;  %v1090_v5 = vpack.c.bf16 %v5533_v58, %v5533_v58 }
 0x555   :  { %v889_v59 = vpop.f32.mrb[24].mxu0  ;;  %4612 = vmatprep.subr.bf16.mxu1 %v5171_v1 }
 0x556   :  { %v898_v60 = vpack.c.bf16 %v889_v59, %v889_v59  ;;  %v4584_v61 = vpop.f32.mrb[25].mxu0 }
 0x557   :  { %v892_v62 = vpop.f32.mrb[26].mxu0 }
 0x558   :  { %v4585_v63 = vpop.f32.mrb[27].mxu0  ;;  %4607 = vmatmul.mubr.msk.bf16.vlgmr.msra.gmra.mrb[32].mxu0 %vm452_vm3, %v898_v60  ;;  %4613 = vmatpush3.bf16.msra.mxu1 %v5356_v7 }
 0x559   :  { %4619 = vmatpush3.bf16.msra.mxu0 %v5344_v6  ;;  %4626 = vmatprep.subr.bf16.mxu1 %v5171_v1 }
 0x55a   :  { %4620 = vmatprep.subr.bf16.mxu0 %v5171_v1  ;;  %4622 = vmatprep.mubr.msk.bf16.mxu0 %vm5172_vm0, %v5171_v1 }
 0x55b   :  { %4615 = vmatmul.mubr.msk.bf16.vlgmr.msra.gmra.mrb[32].mxu1 %vm245_vm2, %v1090_v5 }
 0x55c   :  { %4627 = vmatpush3.bf16.msra.mxu1 %v5371_v14  ;;  %4630 = vmatprep.mubr.msk.bf16.mxu1 %vm5172_vm0, %v5171_v1 }
 0x55d   :  { %4621 = vmatpush3.bf16.msra.mxu0 %v5359_v8  ;;  %4628 = vmatprep.subr.bf16.mxu1 %v5171_v1 }
 0x55e   :  { %4634 = vmatprep.subr.bf16.mxu0 %v5171_v1 }
 0x560   :  { %4623 = vmatmul.mubr.msk.bf16.vlgmr.msra.gmra.mrb[36].mxu0 %vm245_vm2, %v1090_v5  ;;  %4629 = vmatpush3.bf16.msra.mxu1 %v5383_v18 }
 0x561   :  { %4635 = vmatpush3.bf16.msra.mxu0 %v5374_v15  ;;  %4638 = vmatprep.mubr.msk.bf16.mxu0 %vm5172_vm0, %v5171_v1 }
 0x562   :  { %4636 = vmatprep.subr.bf16.mxu0 %v5171_v1  ;;  %4642 = vmatprep.subr.bf16.mxu1 %v5171_v1 }
 0x563   :  { %4631 = vmatmul.mubr.msk.bf16.vlgmr.msra.gmra.mrb[36].mxu1 %vm245_vm2, %v1090_v5 }
 0x564   :  { %4644 = vmatprep.mubr.msk.bf16.mxu1 %vm5172_vm0, %v5171_v1 }
 0x565   :  { %4637 = vmatpush3.bf16.msra.mxu0 %v5386_v19 }
 0x566   :  { %4648 = vmatprep.subr.bf16.mxu0 %v5171_v1 }
 0x568   :  { %4639 = vmatmul.mubr.msk.bf16.vlgmr.msra.gmra.mrb[40].mxu0 %vm245_vm2, %v1090_v5  ;;  %v183_v5 = vld [vmem:[%s5195_s13 + $0x8] sm:$0xff] }
 0x569   :  { %4650 = vmatprep.mubr.msk.bf16.mxu0 %vm5172_vm0, %v5171_v1 }
 0x61e   :  { %v939_v6 = vpop.f32.mrb[24].mxu1 }
 0x61f   :  { %v4590_v7 = vpop.f32.mrb[25].mxu1  ;;  %v1083_v15 = vsel %vm245_vm2, %v939_v6, 0.0 }
 0x620   :  { %v942_v8 = vpop.f32.mrb[26].mxu1 }
 0x621   :  { %v4591_v13 = vpop.f32.mrb[27].mxu1 }
 0x623   :  { %v985_v14 = vpop.f32.mrb[28].mxu0 }
 0x624   :  { %v1084_v18 = vsel %vm245_vm2, %v985_v14, 0.0  ;;  %v4596_v0 = vpop.f32.mrb[29].mxu0 }
 0x625   :  { %v1085_v2 = vadd.f32 %v1084_v18, %v1083_v15  ;;  %v988_v3 = vpop.f32.mrb[30].mxu0 }
 0x626   :  { %v4597_v19 = vpop.f32.mrb[31].mxu0  ;;  %v1031_v4 = vpop.f32.mrb[28].mxu1 }
 0x627   :  { %v1086_v9 = vsel %vm245_vm2, %v1031_v4, 0.0  ;;  %v4602_v10 = vpop.f32.mrb[29].mxu1 }
 0x628   :  { %v1087_v43 = vadd.f32 %v1086_v9, %v1085_v2  ;;  %v1034_v12 = vpop.f32.mrb[30].mxu1 }
 0x629   :  { %v4603_v47 = vpop.f32.mrb[31].mxu1 }
 0x62b   :  { %v1077_v34 = vpop.f32.mrb[32].mxu0 }
 0x62c   :  { %v1088_v16 = vsel %vm245_vm2, %v1077_v34, 0.0  ;;  %v4608_v17 = vpop.f32.mrb[33].mxu0 }
 0x62d   :  { %v5571_v21 = vadd.f32 %v1088_v16, %v1087_v43  ;;  %v1080_v23 = vpop.f32.mrb[34].mxu0 }
 0x62e   :  { %v4609_v24 = vpop.f32.mrb[35].mxu0  ;;  %v1128_v25 = vpop.f32.mrb[32].mxu1 }
 0x62f   :  { %v1129_v26 = vadd.f32 %v5405_v20, %v1128_v25  ;;  %v4616_v27 = vpop.f32.mrb[33].mxu1 }
 0x630   :  { %v1131_v28 = vpop.f32.mrb[34].mxu1 }
 0x631   :  { %v5574_v30 = vpack.c.bf16 %v1129_v26, %v1129_v26  ;;  %v4617_v32 = vpop.f32.mrb[35].mxu1 }
 0x633   :  { %1259 = vrot.lane.b32.xlu0 %v5574_v30, %s5173_s0  ;;  %v1168_v37 = vpop.f32.mrb[36].mxu0 }
 0x634   :  { %v1169_v38 = vadd.f32 %v5408_v22, %v1168_v37  ;;  %v4624_v39 = vpop.f32.mrb[37].mxu0 }
 0x635   :  { %v1171_v40 = vpop.f32.mrb[38].mxu0 }
 0x636   :  { %v5579_v42 = vpack.c.bf16 %v1169_v38, %v1169_v38  ;;  %v4625_v44 = vpop.f32.mrb[39].mxu0  ;;  %v1208_v45 = vpop.f32.mrb[36].mxu1 }
 0x637   :  { %v1209_v46 = vadd.f32 %v5417_v33, %v1208_v45  ;;  %v4632_v20 = vpop.f32.mrb[37].mxu1 }
 0x638   :  { %v1211_v48 = vpop.f32.mrb[38].mxu1  ;;  %1308 = vrot.lane.b32.xlu1 %v5579_v42, %s5173_s0 }
 0x639   :  { %v5584_v49 = vpack.c.bf16 %v1209_v46, %v1209_v46  ;;  %v4633_v51 = vpop.f32.mrb[39].mxu1 }
 0x63b   :  { %1357 = vrot.lane.b32.xlu0 %v5584_v49, %s5173_s0  ;;  %v1248_v22 = vpop.f32.mrb[40].mxu0 }
 0x63c   :  { %v1249_v29 = vadd.f32 %v5422_v36, %v1248_v22  ;;  %v4640_v52 = vpop.f32.mrb[41].mxu0 }
 0x63d   :  { %v1251_v53 = vpop.f32.mrb[42].mxu0 }
 0x63e   :  { %v5589_v54 = vpack.c.bf16 %v1249_v29, %v1249_v29  ;;  %v4641_v55 = vpop.f32.mrb[43].mxu0 }
 0x640   :  { %1406 = vrot.lane.b32.xlu1 %v5589_v54, %s5173_s0 }
 0x6a5   :  { %v1260_v33 = vpop.permute.xlu0 %1259 }
 0x6a6   :  { %v1265_v56 = vsel %vm452_vm3, %v1260_v33, 0 }
 0x6a7   :  { %4643 = vmatpush3.bf16.xpose.msra.mxu1 %v1265_v56 }
 0x6a8   :  { %4654 = vmatprep.subr.bf16.mxu1 %v5171_v1 }
 0x6aa   :  { %v1309_v57 = vpop.permute.xlu1 %1308 }
 0x6ab   :  { %v1314_v59 = vsel %vm452_vm3, %v1309_v57, 0 }
 0x6ac   :  { %4649 = vmatpush3.bf16.xpose.msra.mxu0 %v1314_v59 }
 0x6ad   :  { %v1358_v60 = vpop.permute.xlu0 %1357  ;;  %4660 = vmatprep.subr.bf16.mxu0 %v5171_v1 }
 0x6ae   :  { %v1363_v36 = vsel %vm452_vm3, %v1358_v60, 0  ;;  %4645 = vmatmul.mubr.msk.bf16.vlgmr.msra.gmra.mrb[40].mxu1 %vm452_vm3, %v5574_v30 }
 0x6af   :  { %4655 = vmatpush3.bf16.xpose.msra.mxu1 %v1363_v36  ;;  %4656 = vmatprep.mubr.msk.bf16.mxu1 %vm5172_vm0, %v5171_v1 }
 0x6b0   :  { %4666 = vmatprep.subr.bf16.mxu1 %v5171_v1 }
 0x6b2   :  { %v1407_v61 = vpop.permute.xlu1 %1406 }
 0x6b3   :  { %v1412_v62 = vsel %vm452_vm3, %v1407_v61, 0  ;;  %4651 = vmatmul.mubr.msk.bf16.vlgmr.msra.gmra.mrb[44].mxu0 %vm452_vm3, %v5579_v42  ;;  %v5637_v61 = vld [vmem:[%s5225_s8] ss:$0 sm:$0xff]  ;;  %s6137_s8 = sld [smem:[#allocation14_spill]] }
 0x6b4   :  { %4661 = vmatpush3.bf16.xpose.msra.mxu0 %v1412_v62  ;;  %4662 = vmatprep.mubr.msk.bf16.mxu0 %vm5172_vm0, %v5171_v1  ;;  %v1892_v62 = vadd.f32 %v5637_v61, %v5571_v21 }
 0x6b5   :  { %4672 = vmatprep.subr.bf16.mxu0 %v5171_v1 }
 0x6b6   :  { %4657 = vmatmul.mubr.msk.bf16.vlgmr.msra.gmra.mrb[44].mxu1 %vm452_vm3, %v5584_v49 }
 0x6b7   :  { %4668 = vmatprep.mubr.msk.bf16.mxu1 %vm5172_vm0, %v5171_v1 }
 0x6bb   :  { %4663 = vmatmul.mubr.msk.bf16.vlgmr.msra.gmra.mrb[48].mxu0 %vm452_vm3, %v5589_v54 }
 0x6bc   :  { %4674 = vmatprep.mubr.msk.bf16.mxu0 %vm5172_vm0, %v5171_v1 }
 0x781   :  { %v1301_v63 = vpop.f32.mrb[40].mxu1 }
 0x782   :  { %v1454_v6 = vmul.f32 0.35355338, %v1301_v63  ;;  %v4646_v7 = vpop.f32.mrb[41].mxu1  ;;  %v1894_v63 = vadd.f32 %v1892_v62, %v5366_v11 }
 0x783   :  { %v1304_v8 = vpop.f32.mrb[42].mxu1 }
 0x784   :  { %v4647_v13 = vpop.f32.mrb[43].mxu1  ;;  %v1458_v14 = vadd.f32 %v1454_v6, %v183_v5 }
 0x786   :  { %v1350_v15 = vpop.f32.mrb[44].mxu0  ;;  %v1462_v18 = vsel %vm452_vm3, %v1458_v14, -inf }
 0x787   :  { %v1455_v0 = vmul.f32 0.35355338, %v1350_v15  ;;  %1463 = vmax.xlane.f32.xlu0 %v1462_v18  ;;  %v4652_v2 = vpop.f32.mrb[45].mxu0 }
 0x788   :  { %v1353_v3 = vpop.f32.mrb[46].mxu0 }
 0x789   :  { %v4653_v19 = vpop.f32.mrb[47].mxu0  ;;  %v1399_v4 = vpop.f32.mrb[44].mxu1  ;;  %v1459_v9 = vadd.f32 %v1455_v0, %v183_v5 }
 0x78a   :  { %v1456_v10 = vmul.f32 0.35355338, %v1399_v4  ;;  %v4658_v43 = vpop.f32.mrb[45].mxu1 }
 0x78b   :  { %v1402_v12 = vpop.f32.mrb[46].mxu1  ;;  %v1465_v47 = vsel %vm452_vm3, %v1459_v9, -inf }
 0x78c   :  { %v4659_v34 = vpop.f32.mrb[47].mxu1  ;;  %1466 = vmax.xlane.f32.xlu1 %v1465_v47  ;;  %v1460_v16 = vadd.f32 %v1456_v10, %v183_v5 }
 0x78e   :  { %v1448_v17 = vpop.f32.mrb[48].mxu0  ;;  %v1468_v23 = vsel %vm452_vm3, %v1460_v16, -inf }
 0x78f   :  { %v1457_v24 = vmul.f32 0.35355338, %v1448_v17  ;;  %1469 = vmax.xlane.f32.xlu0 %v1468_v23  ;;  %v4664_v25 = vpop.f32.mrb[49].mxu0 }
 0x790   :  { %v1451_v26 = vpop.f32.mrb[50].mxu0 }
 0x791   :  { %v4665_v27 = vpop.f32.mrb[51].mxu0  ;;  %v1461_v28 = vadd.f32 %v1457_v24, %v183_v5  ;;  %v1898_v5 = vsel %vm245_vm2, %v1894_v63, 0.0 }
 0x793   :  { %v1471_v32 = vsel %vm452_vm3, %v1461_v28, -inf }
 0x794   :  { %1472 = vmax.xlane.f32.xlu0 %v1471_v32 }
 0x79d   :  { %1510 = vrot.lane.b32.xlu1 %v5574_v30, %s5174_s5 }
 0x814   :  { %v1464_v37 = vpop.xlane.xlu0 %1463 }
 0x815   :  { %v1474_v38 = vsub.f32 %v1458_v14, %v1464_v37 }
 0x817   :  { %v1478_v39 = vmul.f32 1.442695, %v1474_v38 }
 0x819   :  { %5052 = vpow2.f32 %v1478_v39  ;;  %v1467_v40 = vpop.xlane.xlu1 %1466 }
 0x81a   :  { %v1475_v44 = vsub.f32 %v1459_v9, %v1467_v40 }
 0x81c   :  { %v1480_v45 = vmul.f32 1.442695, %v1475_v44  ;;  %v1470_v46 = vpop.xlane.xlu0 %1469 }
 0x81d   :  { %v1476_v20 = vsub.f32 %v1460_v16, %v1470_v46  ;;  %v1511_v48 = vpop.permute.xlu1 %1510 }
 0x81e   :  { %5054 = vpow2.f32 %v1480_v45  ;;  %v1516_v51 = vsel %vm707_vm4, %v1511_v48, 0 }
 0x81f   :  { %v1482_v22 = vmul.f32 1.442695, %v1476_v20  ;;  %4667 = vmatpush3.bf16.msra.mxu1 %v1516_v51 }
 0x820   :  { %4678 = vmatprep.subr.bf16.mxu1 %v5171_v1 }
 0x821   :  { %5056 = vpow2.f32 %v1482_v22  ;;  %v1473_v29 = vpop.xlane.xlu0 %1472 }
 0x822   :  { %v1477_v30 = vsub.f32 %v1461_v28, %v1473_v29 }
 0x823   :  { %v5053_v52 = vpop.eup %5052 }
 0x824   :  { %v1484_v53 = vmul.f32 1.442695, %v1477_v30  ;;  %v1486_v55 = vsel %vm452_vm3, %v5053_v52, 0.0 }
 0x825   :  { %1487 = vadd.xlane.f32.xlu1 %v1486_v55 }
 0x826   :  { %5058 = vpow2.f32 %v1484_v53 }
 0x828   :  { %v5055_v33 = vpop.eup %5054 }
 0x829   :  { %v1489_v56 = vsel %vm452_vm3, %v5055_v33, 0.0 }
 0x82a   :  { %1490 = vadd.xlane.f32.xlu0 %v1489_v56 }
 0x82b   :  { %v5057_v57 = vpop.eup %5056 }
 0x82c   :  { %v1492_v59 = vsel %vm452_vm3, %v5057_v57, 0.0 }
 0x82d   :  { %1493 = vadd.xlane.f32.xlu1 %v1492_v59 }
 0x830   :  { %v5059_v60 = vpop.eup %5058 }
 0x831   :  { %v1495_v36 = vsel %vm452_vm3, %v5059_v60, 0.0 }
 0x832   :  { %1496 = vadd.xlane.f32.xlu0 %v1495_v36 }
 0x83e   :  { %1606 = vrot.lane.b32.xlu1 %v5584_v49, %s5174_s5 }
 0x842   :  { %1654 = vrot.lane.b32.xlu1 %v5589_v54, %s5174_s5 }
 0x848   :  { %1558 = vrot.lane.b32.xlu0 %v5579_v42, %s5174_s5 }
 0x867   :  { %1899 = vadd.xlane.f32.xlu0 %v1898_v5 }
 0x8b2   :  { %v1488_v6 = vpop.xlane.xlu1 %1487 }
 0x8b3   :  { %5060 = vrcp.f32 %v1488_v6 }
 0x8b7   :  { %v1491_v7 = vpop.xlane.xlu0 %1490 }
 0x8b8   :  { %5062 = vrcp.f32 %v1491_v7 }
 0x8ba   :  { %v1494_v49 = vpop.xlane.xlu1 %1493 }
 0x8bb   :  { %5064 = vrcp.f32 %v1494_v49 }
 0x8bd   :  { %v5061_v54 = vpop.eup %5060 }
 0x8be   :  { %v1502_v8 = vmul.f32 %v5061_v54, %v5053_v52  ;;  %v1607_v13 = vpop.permute.xlu1 %1606 }
 0x8bf   :  { %v1497_v42 = vpop.xlane.xlu0 %1496  ;;  %v1612_v21 = vsel %vm707_vm4, %v1607_v13, 0 }
 0x8c0   :  { %5066 = vrcp.f32 %v1497_v42  ;;  %v1506_v14 = vpack.c.bf16 %v1502_v8, %v1502_v8 }
 0x8c2   :  { %v5063_v15 = vpop.eup %5062  ;;  %4669 = vmatmul.mubr.msk.bf16.vlgmr.msra.gmra.mrb[48].mxu1 %vm452_vm3, %v1506_v14  ;;  %v1655_v3 = vpop.permute.xlu1 %1654 }
 0x8c3   :  { %v1503_v11 = vmul.f32 %v5063_v15, %v5055_v33  ;;  %4679 = vmatpush3.bf16.msra.mxu1 %v1612_v21  ;;  %v1559_v18 = vpop.permute.xlu0 %1558  ;;  %4680 = vmatprep.mubr.msk.bf16.mxu1 %vm5172_vm0, %v5171_v1  ;;  %v1660_v9 = vsel %vm707_vm4, %v1655_v3, 0 }
 0x8c4   :  { %v1564_v0 = vsel %vm707_vm4, %v1559_v18, 0  ;;  %4690 = vmatprep.subr.bf16.mxu1 %v5171_v1 }
 0x8c5   :  { %v5065_v2 = vpop.eup %5064  ;;  %4673 = vmatpush3.bf16.msra.mxu0 %v1564_v0  ;;  %v1507_v19 = vpack.c.bf16 %v1503_v11, %v1503_v11 }
 0x8c6   :  { %v1504_v4 = vmul.f32 %v5065_v2, %v5057_v57  ;;  %4684 = vmatprep.subr.bf16.mxu0 %v5171_v1 }
 0x8c8   :  { %4675 = vmatmul.mubr.msk.bf16.vlgmr.msra.gmra.mrb[52].mxu0 %vm452_vm3, %v1507_v19  ;;  %v1508_v10 = vpack.c.bf16 %v1504_v4, %v1504_v4 }
 0x8c9   :  { %4685 = vmatpush3.bf16.msra.mxu0 %v1660_v9  ;;  %4686 = vmatprep.mubr.msk.bf16.mxu0 %vm5172_vm0, %v5171_v1  ;;  %v5016_v9 = vld [vmem:[%s5240_s24] sm:$0xff]  }
 0x8ca   :  { %v5067_v43 = vpop.eup %5066  ;;  %4681 = vmatmul.mubr.msk.bf16.vlgmr.msra.gmra.mrb[52].mxu1 %vm452_vm3, %v1508_v10  ;;  %4696 = vmatprep.subr.bf16.mxu0 %v5171_v1  ;;  %v5017_v10 = vld [vmem:[%s5240_s24 + $0x8] sm:$0xff]   ;;  %s6140_s24 = sld [smem:[#allocation13_spill]] }
 0x8cb   :  { %v1505_v12 = vmul.f32 %v5067_v43, %v5059_v60  ;;  %4691 = vmatpush3.bf16.msra.mxu1 %v5499_v31  ;;  %4692 = vmatprep.mubr.msk.bf16.mxu1 %vm5172_vm0, %v5171_v1 }
 0x8cc   :  { %4702 = vmatprep.subr.bf16.mxu1 %v5171_v1 }
 0x8cd   :  { %v1509_v47 = vpack.c.bf16 %v1505_v12, %v1505_v12 }
 0x8d0   :  { %4687 = vmatmul.mubr.msk.bf16.vlgmr.msra.gmra.mrb[56].mxu0 %vm452_vm3, %v1509_v47 }
 0x8d1   :  { %4697 = vmatpush3.bf16.msra.mxu0 %v5505_v35  ;;  %4698 = vmatprep.mubr.msk.bf16.mxu0 %vm5172_vm0, %v5171_v1 }
 0x8d2   :  { %4708 = vmatprep.subr.bf16.mxu0 %v5171_v1 }
 0x8f4   :  { %v1900_v34 = vpop.xlane.xlu0 %1899 }
 0x8f5   :  { %v1905_v16 = vmul.f32 0.03125, %v1900_v34 }
 0x8f7   :  { %v5665_v17 = vsub.f32 %v1894_v63, %v1905_v16 }
 0x8f9   :  { %v1909_v31 = vmul.f32 %v5665_v17, %v5665_v17 }
 0x8fb   :  { %v1911_v23 = vsel %vm245_vm2, %v1909_v31, 0.0 }
 0x8fc   :  { %1912 = vadd.xlane.f32.xlu0 %v1911_v23 }
 0x989   :  { %v1913_v43 = vpop.xlane.xlu0 %1912 }
 0x98a   :  { %v1917_v12 = vmul.f32 0.03125, %v1913_v43  ;;  %v5792_v43 = vld [vmem:[%s6134_s29 + $0x2] ss:$0 sm:$0xff] }
 0x98c   :  { %v1919_v47 = vadd.f32 1e-05, %v1917_v12 }
 0x98e   :  { %5068 = vrsqrt.f32 %v1919_v47 }
 0x995   :  { %v1552_v24 = vpop.f32.mrb[48].mxu1 }
 0x996   :  { %v1702_v25 = vpack.c.bf16 %v1552_v24, %v1552_v24  ;;  %v4670_v26 = vpop.f32.mrb[49].mxu1 }
 0x997   :  { %v1555_v27 = vpop.f32.mrb[50].mxu1 }
 0x998   :  { %v4671_v35 = vpop.f32.mrb[51].mxu1  ;;  %4693 = vmatmul.mubr.msk.bf16.vlgmr.msra.gmra.mrb[56].mxu1 %vm452_vm3, %v1702_v25  ;;  %v5069_v23 = vpop.eup %5068  ;;  %v4261_v25 = vld [vmem:[%s5230_s14] ss:$0 sm:$0xff]  ;;  %s6138_s14 = sld [smem:[#allocation16_spill]] }
 0x999   :  { %4703 = vmatpush3.bf16.msra.mxu1 %v5511_v41  ;;  %4704 = vmatprep.mubr.msk.bf16.mxu1 %vm5172_vm0, %v5171_v1  ;;  %v1923_v24 = vmul.f32 %v5069_v23, %v5665_v17  ;;  %v5021_v17 = vld [vmem:[%s5250_s6 + $0x18] sm:$0xff]  }
 0x99a   :  { %4714 = vmatprep.subr.bf16.mxu1 %v5171_v1 }
 0x99b   :  { %v1600_v28 = vpop.f32.mrb[52].mxu0  ;;  %v1931_v27 = vmul.f32 %v4261_v25, %v1923_v24 }
 0x99c   :  { %v1703_v32 = vpack.c.bf16 %v1600_v28, %v1600_v28  ;;  %v4676_v37 = vpop.f32.mrb[53].mxu0  ;;  %v4262_v28 = vld [vmem:[%s5235_s19] ss:$0 sm:$0xff]  ;;  %s6139_s19 = sld [smem:[#allocation12_spill]] }
 0x99d   :  { %v1603_v38 = vpop.f32.mrb[54].mxu0  ;;  %v1648_v39 = vpop.f32.mrb[52].mxu1  ;;  %v1939_v37 = vadd.f32 %v4262_v28, %v1931_v27 }
 0x99e   :  { %v1704_v40 = vpack.c.bf16 %v1648_v39, %v1648_v39  ;;  %v4677_v44 = vpop.f32.mrb[55].mxu0  ;;  %v4682_v45 = vpop.f32.mrb[53].mxu1  ;;  %4699 = vmatmul.mubr.msk.bf16.vlgmr.msra.gmra.mrb[60].mxu0 %vm452_vm3, %v1703_v32 }
 0x99f   :  { %v1651_v46 = vpop.f32.mrb[54].mxu1  ;;  %4709 = vmatpush3.bf16.msra.mxu0 %v5520_v50  ;;  %4710 = vmatprep.mubr.msk.bf16.mxu0 %vm5172_vm0, %v5171_v1  ;;  %v4263_v44 = vld [vmem:[%s5245_s30] ss:$0 sm:$0xff]  ;;  %s6141_s30 = sld [smem:[#allocation15_spill]] }
 0x9a0   :  { %v4683_v41 = vpop.f32.mrb[55].mxu1  ;;  %4705 = vmatmul.mubr.msk.bf16.vlgmr.msra.gmra.mrb[60].mxu1 %vm452_vm3, %v1704_v40  ;;  %4722 = vmatprep.subr.bf16.mxu0 %v5171_v1  ;;  %v5020_v40 = vld [vmem:[%s5250_s6 + $0x10] sm:$0xff]  }
 0x9a1   :  { %4718 = vmatprep.mubr.msk.bf16.mxu1 %vm5172_vm0, %v5171_v1  ;;  %4715 = vmatpush3.bf16.msra.mxu1 %v5016_v9  ;;  %v5772_v9 = vld [vmem:[%s6131_s9 + $0x30] sm:$0xff]  }
 0x9a2   :  { %4716 = vmatprep.subr.bf16.mxu1 %v5171_v1 }
 0x9a3   :  { %v1696_v20 = vpop.f32.mrb[56].mxu0 }
 0x9a4   :  { %v1705_v48 = vpack.c.bf16 %v1696_v20, %v1696_v20  ;;  %v4688_v51 = vpop.f32.mrb[57].mxu0 }
 0x9a5   :  { %v1699_v22 = vpop.f32.mrb[58].mxu0  ;;  %4717 = vmatpush3.bf16.msra.mxu1 %v5017_v10  ;;  %v5778_v10 = vld [vmem:[%s6131_s9 + $0x38] sm:$0xff]  }
 0x9a6   :  { %v4689_v29 = vpop.f32.mrb[59].mxu0  ;;  %4711 = vmatmul.mubr.msk.bf16.vlgmr.msra.gmra.mrb[64].mxu0 %vm452_vm3, %v1705_v48  ;;  %4734 = vmatprep.subr.bf16.mxu1 %v5171_v1 }
 0x9a7   :  { %4730 = vmatprep.mubr.msk.bf16.mxu0 %vm5172_vm0, %v5171_v1 }
 0xa6b   :  { %v1743_v50 = vpop.f32.mrb[56].mxu1 }
 0xa6c   :  { %v4694_v30 = vpop.f32.mrb[57].mxu1  ;;  %v1878_v33 = vsel %vm245_vm2, %v1743_v50, 0.0 }
 0xa6d   :  { %v1746_v52 = vpop.f32.mrb[58].mxu1  ;;  %v4267_v30 = vld [vmem:[%s5255_s12] ss:$0 sm:$0xff] }
 0xa6e   :  { %v4695_v53 = vpop.f32.mrb[59].mxu1 }
 0xa71   :  { %v1786_v55 = vpop.f32.mrb[60].mxu0 }
 0xa72   :  { %v1879_v56 = vsel %vm245_vm2, %v1786_v55, 0.0  ;;  %v4700_v57 = vpop.f32.mrb[61].mxu0 }
 0xa73   :  { %v1880_v59 = vadd.f32 %v1879_v56, %v1878_v33  ;;  %v1789_v60 = vpop.f32.mrb[62].mxu0  ;;  %v1829_v36 = vpop.f32.mrb[60].mxu1 }
 0xa74   :  { %v1881_v62 = vsel %vm245_vm2, %v1829_v36, 0.0  ;;  %v4701_v63 = vpop.f32.mrb[63].mxu0  ;;  %v4706_v5 = vpop.f32.mrb[61].mxu1 }
 0xa75   :  { %v1882_v6 = vadd.f32 %v1881_v62, %v1880_v59  ;;  %v1832_v7 = vpop.f32.mrb[62].mxu1 }
 0xa76   :  { %v4707_v49 = vpop.f32.mrb[63].mxu1  ;;  %v5725_v7 = vld [vmem:[%s6131_s9] sm:$0xff]  }
 0xa77   :  { %v5728_v49 = vld [vmem:[%s6131_s9 + $0x20] sm:$0xff]  }
 0xa79   :  { %v1872_v54 = vpop.f32.mrb[64].mxu0 }
 0xa7a   :  { %v1883_v8 = vsel %vm245_vm2, %v1872_v54, 0.0  ;;  %v4712_v13 = vpop.f32.mrb[65].mxu0  ;;  %v5733_v54 = vld [vmem:[%s6131_s9 + $0x8] sm:$0xff]  }
 0xa7b   :  { %v1884_v42 = vadd.f32 %v1883_v8, %v1882_v6  ;;  %v1875_v14 = vpop.f32.mrb[66].mxu0  ;;  %v5736_v8 = vld [vmem:[%s6131_s9 + $0x28] sm:$0xff]  }
 0xa7c   :  { %v4713_v15 = vpop.f32.mrb[67].mxu0 }
 0xa7d   :  { %v1893_v21 = vadd.f32 %v5637_v61, %v1884_v42  ;;  %v5019_v61 = vld [vmem:[%s5250_s6 + $0x8] sm:$0xff]  }
 0xa7f   :  { %v1895_v11 = vadd.f32 %v1893_v21, %v5533_v58  ;;  %v5018_v58 = vld [vmem:[%s5250_s6] sm:$0xff]   ;;  %s5176_s6 = smov [#allocation2]  }
 0xa80   :  { %4723 = vmatpush3.bf16.msra.mxu0 %v5018_v58  ;;  %v5745_v21 = vld [vmem:[%s6132_s21] ss:$0 sm:$0xff]  ;;  %s4177_s12 = sshll.u32 %s5176_s6, 4  ;;  %s4178_s12 = int_to_ptr.vmem [resolvable:$true] %s4177_s12 }
 0xa81   :  { %v1901_v18 = vsel %vm245_vm2, %v1895_v11, 0.0  ;;  %4724 = vmatprep.subr.bf16.mxu0 %v5171_v1  ;;  %v5789_v58 = vld [vmem:[%s6134_s29] ss:$0 sm:$0xff]  ;;  %p5123_p1 = scmp.lt.s32.totalorder %s4178_s12, %s4178_s12 }
 0xa82   :  { %1902 = vadd.xlane.f32.xlu1 %v1901_v18  ;;  %v5748_v18 = vld [vmem:[%s6133_s25] ss:$0 sm:$0xff] }
 0xa84   :  { %4725 = vmatpush3.bf16.msra.mxu0 %v5019_v61 }
 0xa85   :  { %4726 = vmatprep.subr.bf16.mxu0 %v5171_v1 }
 0xa88   :  { %4727 = vmatpush3.bf16.msra.mxu0 %v5020_v40 }
 0xa89   :  { %4728 = vmatprep.subr.bf16.mxu0 %v5171_v1 }
 0xa8c   :  { %4729 = vmatpush3.bf16.msra.mxu0 %v5021_v17 }
 0xa8d   :  { %4750 = vmatprep.subr.bf16.mxu0 %v5171_v1 }
 0xb0f   :  { %v1903_v0 = vpop.xlane.xlu1 %1902 }
 0xb10   :  { %v1906_v2 = vmul.f32 0.03125, %v1903_v0 }
 0xb12   :  { %v1908_v3 = vsub.f32 %v1895_v11, %v1906_v2 }
 0xb14   :  { %v1910_v19 = vmul.f32 %v1908_v3, %v1908_v3 }
 0xb16   :  { %v1914_v4 = vsel %vm245_vm2, %v1910_v19, 0.0 }
 0xb17   :  { %1915 = vadd.xlane.f32.xlu0 %v1914_v4  ;;  %v5763_v4 = vld [vmem:[%s6131_s9 + $0x18] sm:$0xff]  }
 0xba4   :  { %v1916_v34 = vpop.xlane.xlu0 %1915 }
 0xba5   :  { %v1918_v16 = vmul.f32 0.03125, %v1916_v34 }
 0xba7   :  { %v1920_v31 = vadd.f32 1e-05, %v1918_v16 }
 0xba9   :  { %5070 = vrsqrt.f32 %v1920_v31 }
 0xbb3   :  { %v5071_v26 = vpop.eup %5070 }
 0xbb4   :  { %v1924_v35 = vmul.f32 %v5071_v26, %v1908_v3  ;;  %v5755_v3 = vld [vmem:[%s6131_s9 + $0x10] sm:$0xff]  }
 0xbb6   :  { %v1932_v32 = vmul.f32 %v4261_v25, %v1924_v35  ;;  %v5801_v35 = vld [vmem:[%s6134_s29 + $0x1] ss:$0 sm:$0xff] }
 0xbb8   :  { %v5705_v38 = vadd.f32 %v4262_v28, %v1932_v32 }
 0xbba   :  { %v1945_v39 = vpack.c.bf16 %v5705_v38, %v1939_v37 }
 0xbbc   :  { %4719 = vmatmul.mubr.msk.bf16.vlgmr.msra.gmra.mrb[64].mxu1 %vm245_vm2, %v1945_v39 }
 0xbbd   :  { %4738 = vmatprep.mubr.msk.bf16.mxu1 %vm5172_vm0, %v5171_v1  ;;  %4735 = vmatpush3.bf16.msra.mxu1 %v5725_v7 }
 0xbbe   :  { %4736 = vmatprep.subr.bf16.mxu1 %v5171_v1 }
 0xbc1   :  { %4737 = vmatpush3.bf16.msra.mxu1 %v5733_v54 }
 0xbc2   :  { %4742 = vmatprep.subr.bf16.mxu1 %v5171_v1 }
 0xc8f   :  { %v2002_v45 = vpop.f32.mrb[64].mxu1 }
 0xc90   :  { %v2003_v46 = vadd.f32 %v4263_v44, %v2002_v45  ;;  %v4720_v41 = vpop.f32.mrb[65].mxu1  ;;  %v5813_v45 = vld [vmem:[%s6134_s29 + $0x3] ss:$0 sm:$0xff] }
 0xc91   :  { %v2005_v20 = vpop.f32.mrb[66].mxu1 }
 0xc92   :  { %v2006_v48 = vadd.f32 %v4263_v44, %v2005_v20  ;;  %v4721_v51 = vpop.f32.mrb[67].mxu1  ;;  %v2009_v22 = vmax.f32 %v2003_v46, 0.0 }
 0xc94   :  { %v2010_v29 = vmax.f32 %v2006_v48, 0.0 }
 0xc96   :  { %v2019_v50 = vpack.c.bf16 %v2010_v29, %v2009_v22 }
 0xc98   :  { %4731 = vmatmul.mubr.msk.bf16.vlgmr.msra.gmra.mrb[68].mxu0 %vm2051_vm5, %v2019_v50 }
 0xc99   :  { %4754 = vmatprep.mubr.msk.bf16.mxu0 %vm5172_vm0, %v5171_v1  ;;  %4751 = vmatpush3.bf16.msra.mxu0 %v5728_v49 }
 0xc9a   :  { %4752 = vmatprep.subr.bf16.mxu0 %v5171_v1 }
 0xc9d   :  { %4753 = vmatpush3.bf16.msra.mxu0 %v5736_v8 }
 0xc9e   :  { %4766 = vmatprep.subr.bf16.mxu0 %v5171_v1 }
 0xd6b   :  { %v2089_v52 = vpop.f32.mrb[68].mxu0 }
 0xd6c   :  { %v2090_v53 = vadd.f32 %v4267_v30, %v2089_v52  ;;  %v4732_v55 = vpop.f32.mrb[69].mxu0 }
 0xd6d   :  { %v2092_v33 = vpop.f32.mrb[70].mxu0 }
 0xd6e   :  { %v5720_v56 = vadd.f32 %v4267_v30, %v2092_v33  ;;  %v4733_v57 = vpop.f32.mrb[71].mxu0  ;;  %v2096_v59 = vadd.f32 %v2090_v53, %v1939_v37 }
 0xd70   :  { %v2100_v60 = vsel %vm245_vm2, %v2096_v59, 0.0 }
 0xd71   :  { %2101 = vadd.xlane.f32.xlu1 %v2100_v60 }
 0xdfe   :  { %v2102_v36 = vpop.xlane.xlu1 %2101 }
 0xdff   :  { %v2106_v62 = vmul.f32 0.03125, %v2102_v36 }
 0xe01   :  { %v2108_v63 = vsub.f32 %v2096_v59, %v2106_v62 }
 0xe03   :  { %v2110_v5 = vmul.f32 %v2108_v63, %v2108_v63 }
 0xe05   :  { %v2112_v6 = vsel %vm245_vm2, %v2110_v5, 0.0  ;;  %v5116_v5 = vld [vmem:[%s5195_s13] sm:$0xff] }
 0xe06   :  { %2113 = vadd.xlane.f32.xlu0 %v2112_v6 }
 0xe93   :  { %v2114_v13 = vpop.xlane.xlu0 %2113 }
 0xe94   :  { %v2118_v42 = vmul.f32 0.03125, %v2114_v13 }
 0xe96   :  { %v2120_v14 = vadd.f32 1e-05, %v2118_v42 }
 0xe98   :  { %5072 = vrsqrt.f32 %v2120_v14 }
 0xea2   :  { %v5073_v15 = vpop.eup %5072 }
 0xea3   :  { %v2124_v11 = vmul.f32 %v5073_v15, %v2108_v63 }
 0xea5   :  { %v2132_v0 = vmul.f32 %v5745_v21, %v2124_v11 }
 0xea7   :  { %v5752_v2 = vadd.f32 %v5748_v18, %v2132_v0 }
 0xea9   :  { %v2166_v19 = vpack.c.bf16 %v5752_v2, %v5752_v2 }
 0xeab   :  { %4739 = vmatmul.mubr.msk.bf16.vlgmr.msra.gmra.mrb[68].mxu1 %vm245_vm2, %v2166_v19  ;;  %4755 = vmatmul.mubr.msk.bf16.vlgmr.msra.gmra.mrb[72].mxu0 %vm245_vm2, %v2166_v19 }
 0xeac   :  { %4743 = vmatpush3.bf16.msra.mxu1 %v5755_v3  ;;  %4746 = vmatprep.mubr.msk.bf16.mxu1 %vm5172_vm0, %v5171_v1 }
 0xead   :  { %4744 = vmatprep.subr.bf16.mxu1 %v5171_v1  ;;  %4768 = vmatprep.mubr.msk.bf16.mxu0 %vm5172_vm0, %v5171_v1 }
 0xeb0   :  { %4745 = vmatpush3.bf16.msra.mxu1 %v5763_v4 }
 0xeb1   :  { %4758 = vmatprep.subr.bf16.mxu1 %v5171_v1 }
 0xeb3   :  { %4747 = vmatmul.mubr.msk.bf16.vlgmr.msra.gmra.mrb[72].mxu1 %vm245_vm2, %v2166_v19 }
 0xeb4   :  { %4759 = vmatpush3.bf16.msra.mxu1 %v5772_v9  ;;  %4762 = vmatprep.mubr.msk.bf16.mxu1 %vm5172_vm0, %v5171_v1 }
 0xeb5   :  { %4760 = vmatprep.subr.bf16.mxu1 %v5171_v1 }
 0xeb8   :  { %4761 = vmatpush3.bf16.msra.mxu1 %v5778_v10 }
 0xeb9   :  { %4772 = vmatprep.subr.bf16.mxu1 %v5171_v1 }
 0xebb   :  { %4763 = vmatmul.mubr.msk.bf16.vlgmr.msra.gmra.mrb[76].mxu1 %vm245_vm2, %v2166_v19 }
 0xebc   :  { %4774 = vmatprep.mubr.msk.bf16.mxu1 %vm5172_vm0, %v5171_v1 }
 0xf7e   :  { %v2240_v61 = vpop.f32.mrb[68].mxu1  ;;  %v2344_v12 = vpop.f32.mrb[72].mxu0 }
 0xf7f   :  { %v2241_v47 = vadd.f32 %v5789_v58, %v2240_v61  ;;  %v4740_v34 = vpop.f32.mrb[69].mxu1  ;;  %v4756_v16 = vpop.f32.mrb[73].mxu0  ;;  %v2345_v25 = vadd.f32 %v5792_v43, %v2344_v12 }
 0xf80   :  { %v2243_v31 = vpop.f32.mrb[70].mxu1  ;;  %v2347_v23 = vpop.f32.mrb[74].mxu0 }
 0xf81   :  { %v5795_v24 = vpack.c.bf16 %v2241_v47, %v2241_v47  ;;  %v4741_v26 = vpop.f32.mrb[71].mxu1  ;;  %v4757_v27 = vpop.f32.mrb[75].mxu0  ;;  %v5803_v28 = vpack.c.bf16 %v2345_v25, %v2345_v25 }
 0xf83   :  { %2407 = vrot.lane.b32.xlu1 %v5795_v24, %s5173_s0 }
 0xf86   :  { %v2292_v32 = vpop.f32.mrb[72].mxu1 }
 0xf87   :  { %v2293_v37 = vadd.f32 %v5801_v35, %v2292_v32  ;;  %v4748_v39 = vpop.f32.mrb[73].mxu1  ;;  %2505 = vrot.lane.b32.xlu1 %v5803_v28, %s5173_s0 }
 0xf88   :  { %v2295_v40 = vpop.f32.mrb[74].mxu1 }
 0xf89   :  { %v5808_v17 = vpack.c.bf16 %v2293_v37, %v2293_v37  ;;  %v4749_v44 = vpop.f32.mrb[75].mxu1 }
 0xf8b   :  { %2456 = vrot.lane.b32.xlu0 %v5808_v17, %s5173_s0 }
 0xf8e   :  { %v2396_v46 = vpop.f32.mrb[76].mxu1 }
 0xf8f   :  { %v2397_v41 = vadd.f32 %v5813_v45, %v2396_v46  ;;  %v4764_v20 = vpop.f32.mrb[77].mxu1 }
 0xf90   :  { %v2399_v48 = vpop.f32.mrb[78].mxu1 }
 0xf91   :  { %v5816_v51 = vpack.c.bf16 %v2397_v41, %v2397_v41  ;;  %v4765_v22 = vpop.f32.mrb[79].mxu1 }
 0xf93   :  { %2554 = vrot.lane.b32.xlu1 %v5816_v51, %s5173_s0 }
 0xff5   :  { %v2408_v29 = vpop.permute.xlu1 %2407 }
 0xff6   :  { %v2413_v50 = vsel %vm452_vm3, %v2408_v29, 0 }
 0xff7   :  { %4767 = vmatpush3.bf16.xpose.msra.mxu0 %v2413_v50 }
 0xff8   :  { %4778 = vmatprep.subr.bf16.mxu0 %v5171_v1 }
 0xff9   :  { %v2506_v30 = vpop.permute.xlu1 %2505 }
 0xffa   :  { %v2511_v53 = vsel %vm452_vm3, %v2506_v30, 0 }
 0xffd   :  { %v2457_v52 = vpop.permute.xlu0 %2456 }
 0xffe   :  { %v2462_v55 = vsel %vm452_vm3, %v2457_v52, 0  ;;  %4769 = vmatmul.mubr.msk.bf16.vlgmr.msra.gmra.mrb[76].mxu0 %vm452_vm3, %v5795_v24 }
 0xfff   :  { %4773 = vmatpush3.bf16.xpose.msra.mxu1 %v2462_v55  ;;  %4779 = vmatpush3.bf16.xpose.msra.mxu0 %v2511_v53 }
0x1000   :  { %4780 = vmatprep.mubr.msk.bf16.mxu0 %vm5172_vm0, %v5171_v1  ;;  %4784 = vmatprep.subr.bf16.mxu1 %v5171_v1 }
0x1001   :  { %4790 = vmatprep.subr.bf16.mxu0 %v5171_v1 }
0x1005   :  { %v2555_v33 = vpop.permute.xlu1 %2554 }
0x1006   :  { %v2560_v57 = vsel %vm452_vm3, %v2555_v33, 0  ;;  %4775 = vmatmul.mubr.msk.bf16.vlgmr.msra.gmra.mrb[80].mxu1 %vm452_vm3, %v5808_v17  ;;  %4781 = vmatmul.mubr.msk.bf16.vlgmr.msra.gmra.mrb[80].mxu0 %vm452_vm3, %v5803_v28 }
0x1007   :  { %4785 = vmatpush3.bf16.xpose.msra.mxu1 %v2560_v57  ;;  %4786 = vmatprep.mubr.msk.bf16.mxu1 %vm5172_vm0, %v5171_v1 }
0x1008   :  { %4792 = vmatprep.mubr.msk.bf16.mxu0 %vm5172_vm0, %v5171_v1  ;;  %4796 = vmatprep.subr.bf16.mxu1 %v5171_v1 }
0x100e   :  { %4787 = vmatmul.mubr.msk.bf16.vlgmr.msra.gmra.mrb[84].mxu1 %vm452_vm3, %v5816_v51 }
0x100f   :  { %4798 = vmatprep.mubr.msk.bf16.mxu1 %vm5172_vm0, %v5171_v1 }
0x10d1   :  { %v2449_v59 = vpop.f32.mrb[76].mxu0 }
0x10d2   :  { %v2602_v60 = vmul.f32 0.35355338, %v2449_v59  ;;  %v4770_v36 = vpop.f32.mrb[77].mxu0 }
0x10d3   :  { %v2452_v62 = vpop.f32.mrb[78].mxu0 }
0x10d4   :  { %v4771_v63 = vpop.f32.mrb[79].mxu0  ;;  %v2606_v6 = vadd.f32 %v5116_v5, %v2602_v60 }
0x10d6   :  { %v2610_v13 = vsel %vm452_vm3, %v2606_v6, -inf }
0x10d7   :  { %2611 = vmax.xlane.f32.xlu0 %v2610_v13 }
0x10d9   :  { %v2498_v42 = vpop.f32.mrb[80].mxu1  ;;  %v2547_v14 = vpop.f32.mrb[80].mxu0 }
0x10da   :  { %v2603_v15 = vmul.f32 0.35355338, %v2498_v42  ;;  %v2604_v11 = vmul.f32 0.35355338, %v2547_v14  ;;  %v4776_v0 = vpop.f32.mrb[81].mxu1  ;;  %v4782_v19 = vpop.f32.mrb[81].mxu0  ;;  %v2097_v42 = vadd.f32 %v5720_v56, %v5705_v38 }
0x10db   :  { %v2501_v61 = vpop.f32.mrb[82].mxu1  ;;  %v2550_v12 = vpop.f32.mrb[82].mxu0 }
0x10dc   :  { %v4777_v47 = vpop.f32.mrb[83].mxu1  ;;  %v4783_v34 = vpop.f32.mrb[83].mxu0  ;;  %v2607_v16 = vadd.f32 %v5116_v5, %v2603_v15  ;;  %v2608_v31 = vadd.f32 %v5116_v5, %v2604_v11  ;;  %v2103_v14 = vsel %vm245_vm2, %v2097_v42, 0.0 }
0x10de   :  { %v2613_v23 = vsel %vm452_vm3, %v2607_v16, -inf  ;;  %v2616_v25 = vsel %vm452_vm3, %v2608_v31, -inf }
0x10df   :  { %2614 = vmax.xlane.f32.xlu1 %v2613_v23  ;;  %2617 = vmax.xlane.f32.xlu0 %v2616_v25 }
0x10e1   :  { %v2596_v26 = vpop.f32.mrb[84].mxu1 }
0x10e2   :  { %v2605_v27 = vmul.f32 0.35355338, %v2596_v26  ;;  %v4788_v32 = vpop.f32.mrb[85].mxu1 }
0x10e3   :  { %v2599_v37 = vpop.f32.mrb[86].mxu1 }
0x10e4   :  { %v4789_v39 = vpop.f32.mrb[87].mxu1  ;;  %v2609_v40 = vadd.f32 %v5116_v5, %v2605_v27 }
0x10e6   :  { %v2619_v44 = vsel %vm452_vm3, %v2609_v40, -inf }
0x10e7   :  { %2620 = vmax.xlane.f32.xlu0 %v2619_v44 }
0x10f0   :  { %2658 = vrot.lane.b32.xlu1 %v5795_v24, %s5174_s5 }
0x1164   :  { %v2612_v46 = vpop.xlane.xlu0 %2611 }
0x1165   :  { %v2622_v41 = vsub.f32 %v2606_v6, %v2612_v46 }
0x1167   :  { %v2626_v20 = vmul.f32 1.442695, %v2622_v41 }
0x1169   :  { %5074 = vpow2.f32 %v2626_v20 }
0x116c   :  { %v2615_v48 = vpop.xlane.xlu1 %2614  ;;  %v2618_v22 = vpop.xlane.xlu0 %2617 }
0x116d   :  { %v2623_v29 = vsub.f32 %v2607_v16, %v2615_v48  ;;  %v2624_v50 = vsub.f32 %v2608_v31, %v2618_v22  ;;  %v2162_v48 = vld [vmem:[%s6135_s3] sm:$0xf] }
0x116e   :  { %v5887_v22 = vsel %vm707_vm4, %v2162_v48, 0 }
0x116f   :  { %v2628_v30 = vmul.f32 1.442695, %v2623_v29  ;;  %v2630_v52 = vmul.f32 1.442695, %v2624_v50  ;;  %v2163_v29 = vld [vmem:[%s6135_s3 + $0x4] sm:$0xf] }
0x1170   :  { %v2659_v53 = vpop.permute.xlu1 %2658  ;;  %v5893_v50 = vsel %vm707_vm4, %v2163_v29, 0 }
0x1171   :  { %5076 = vpow2.f32 %v2628_v30  ;;  %v2664_v55 = vsel %vm707_vm4, %v2659_v53, 0 }
0x1172   :  { %5078 = vpow2.f32 %v2630_v52  ;;  %4791 = vmatpush3.bf16.msra.mxu0 %v2664_v55  ;;  %v2164_v55 = vld [vmem:[%s6135_s3 + $0x8] sm:$0xf] }
0x1173   :  { %v5075_v33 = vpop.eup %5074  ;;  %4802 = vmatprep.subr.bf16.mxu0 %v5171_v1 }
0x1174   :  { %v2621_v24 = vpop.xlane.xlu0 %2620  ;;  %v2634_v57 = vsel %vm452_vm3, %v5075_v33, 0.0 }
0x1175   :  { %v2625_v59 = vsub.f32 %v2609_v40, %v2621_v24  ;;  %2635 = vadd.xlane.f32.xlu1 %v2634_v57 }
0x1177   :  { %v2632_v60 = vmul.f32 1.442695, %v2625_v59  ;;  %v5899_v59 = vsel %vm707_vm4, %v2164_v55, 0 }
0x1179   :  { %5080 = vpow2.f32 %v2632_v60 }
0x117b   :  { %v5077_v36 = vpop.eup %5076 }
0x117c   :  { %v5079_v62 = vpop.eup %5078  ;;  %v2637_v63 = vsel %vm452_vm3, %v5077_v36, 0.0 }
0x117d   :  { %2638 = vadd.xlane.f32.xlu0 %v2637_v63  ;;  %v2640_v5 = vsel %vm452_vm3, %v5079_v62, 0.0 }
0x117e   :  { %2641 = vadd.xlane.f32.xlu1 %v2640_v5  ;;  %v2165_v5 = vld [vmem:[%s6135_s3 + $0xc] sm:$0xf] }
0x1183   :  { %v5081_v6 = vpop.eup %5080 }
0x1184   :  { %v2643_v13 = vsel %vm452_vm3, %v5081_v6, 0.0 }
0x1185   :  { %2644 = vadd.xlane.f32.xlu0 %v2643_v13 }
0x118f   :  { %2754 = vrot.lane.b32.xlu1 %v5803_v28, %s5174_s5 }
0x1193   :  { %2802 = vrot.lane.b32.xlu1 %v5816_v51, %s5174_s5 }
0x119b   :  { %2706 = vrot.lane.b32.xlu0 %v5808_v17, %s5174_s5 }
0x11ba   :  { %2104 = vadd.xlane.f32.xlu0 %v2103_v14 }
0x1202   :  { %v2636_v15 = vpop.xlane.xlu1 %2635 }
0x1203   :  { %5082 = vrcp.f32 %v2636_v15 }
0x120a   :  { %v2639_v11 = vpop.xlane.xlu0 %2638 }
0x120b   :  { %v2642_v0 = vpop.xlane.xlu1 %2641  ;;  %5084 = vrcp.f32 %v2639_v11 }
0x120c   :  { %5086 = vrcp.f32 %v2642_v0 }
0x120d   :  { %v5083_v19 = vpop.eup %5082 }
0x120e   :  { %v2650_v28 = vmul.f32 %v5083_v19, %v5075_v33  ;;  %v5909_v19 = vsel %vm707_vm4, %v2165_v5, 0 }
0x120f   :  { %v2755_v61 = vpop.permute.xlu1 %2754 }
0x1210   :  { %v2654_v12 = vpack.c.bf16 %v2650_v28, %v2650_v28  ;;  %v2760_v51 = vsel %vm707_vm4, %v2755_v61, 0 }
0x1212   :  { %4793 = vmatmul.mubr.msk.bf16.vlgmr.msra.gmra.mrb[84].mxu0 %vm452_vm3, %v2654_v12  ;;  %v2645_v17 = vpop.xlane.xlu0 %2644 }
0x1213   :  { %4803 = vmatpush3.bf16.msra.mxu0 %v2760_v51  ;;  %5088 = vrcp.f32 %v2645_v17  ;;  %4804 = vmatprep.mubr.msk.bf16.mxu0 %vm5172_vm0, %v5171_v1  ;;  %v2803_v23 = vpop.permute.xlu1 %2802 }
0x1214   :  { %4814 = vmatprep.subr.bf16.mxu0 %v5171_v1  ;;  %v2808_v27 = vsel %vm707_vm4, %v2803_v23, 0 }
0x1215   :  { %v5085_v38 = vpop.eup %5084 }
0x1216   :  { %v5087_v56 = vpop.eup %5086  ;;  %v2651_v47 = vmul.f32 %v5085_v38, %v5077_v36  ;;  %v2707_v34 = vpop.permute.xlu0 %2706 }
0x1217   :  { %v2652_v16 = vmul.f32 %v5087_v56, %v5079_v62  ;;  %v2712_v31 = vsel %vm707_vm4, %v2707_v34, 0 }
0x1218   :  { %4797 = vmatpush3.bf16.msra.mxu1 %v2712_v31  ;;  %v2655_v25 = vpack.c.bf16 %v2651_v47, %v2651_v47 }
0x1219   :  { %v2656_v26 = vpack.c.bf16 %v2652_v16, %v2652_v16  ;;  %4808 = vmatprep.subr.bf16.mxu1 %v5171_v1 }
0x121b   :  { %4805 = vmatmul.mubr.msk.bf16.vlgmr.msra.gmra.mrb[88].mxu0 %vm452_vm3, %v2656_v26  ;;  %4799 = vmatmul.mubr.msk.bf16.vlgmr.msra.gmra.mrb[88].mxu1 %vm452_vm3, %v2655_v25 }
0x121c   :  { %4809 = vmatpush3.bf16.msra.mxu1 %v2808_v27  ;;  %4810 = vmatprep.mubr.msk.bf16.mxu1 %vm5172_vm0, %v5171_v1 }
0x121d   :  { %v5089_v32 = vpop.eup %5088  ;;  %4816 = vmatprep.mubr.msk.bf16.mxu0 %vm5172_vm0, %v5171_v1  ;;  %4820 = vmatprep.subr.bf16.mxu1 %v5171_v1 }
0x121e   :  { %v2653_v37 = vmul.f32 %v5089_v32, %v5081_v6  ;;  %4815 = vmatpush3.bf16.msra.mxu0 %v5887_v22 }
0x121f   :  { %4826 = vmatprep.subr.bf16.mxu0 %v5171_v1 }
0x1220   :  { %v2657_v39 = vpack.c.bf16 %v2653_v37, %v2653_v37 }
0x1223   :  { %4811 = vmatmul.mubr.msk.bf16.vlgmr.msra.gmra.mrb[92].mxu1 %vm452_vm3, %v2657_v39 }
0x1224   :  { %4822 = vmatprep.mubr.msk.bf16.mxu1 %vm5172_vm0, %v5171_v1  ;;  %4821 = vmatpush3.bf16.msra.mxu1 %v5893_v50 }
0x1225   :  { %4832 = vmatprep.subr.bf16.mxu1 %v5171_v1 }
0x1247   :  { %v2105_v40 = vpop.xlane.xlu0 %2104 }
0x1248   :  { %v2107_v44 = vmul.f32 0.03125, %v2105_v40 }
0x124a   :  { %v2109_v46 = vsub.f32 %v2097_v42, %v2107_v44 }
0x124c   :  { %v2111_v41 = vmul.f32 %v2109_v46, %v2109_v46 }
0x124e   :  { %v2115_v20 = vsel %vm245_vm2, %v2111_v41, 0.0 }
0x124f   :  { %2116 = vadd.xlane.f32.xlu1 %v2115_v20 }
0x12dc   :  { %v2117_v30 = vpop.xlane.xlu1 %2116 }
0x12dd   :  { %v2119_v52 = vmul.f32 0.03125, %v2117_v30 }
0x12df   :  { %v2121_v53 = vadd.f32 1e-05, %v2119_v52 }
0x12e1   :  { %5090 = vrsqrt.f32 %v2121_v53 }
0x12e5   :  { %v2700_v33 = vpop.f32.mrb[84].mxu0 }
0x12e6   :  { %v2850_v24 = vpack.c.bf16 %v2700_v33, %v2700_v33  ;;  %v4794_v57 = vpop.f32.mrb[85].mxu0 }
0x12e7   :  { %v2703_v60 = vpop.f32.mrb[86].mxu0 }
0x12e8   :  { %v4795_v36 = vpop.f32.mrb[87].mxu0  ;;  %4817 = vmatmul.mubr.msk.bf16.vlgmr.msra.gmra.mrb[92].mxu0 %vm452_vm3, %v2850_v24 }
0x12e9   :  { %4827 = vmatpush3.bf16.msra.mxu0 %v5899_v59  ;;  %4828 = vmatprep.mubr.msk.bf16.mxu0 %vm5172_vm0, %v5171_v1 }
0x12ea   :  { %4838 = vmatprep.subr.bf16.mxu0 %v5171_v1 }
0x12eb   :  { %v5091_v62 = vpop.eup %5090 }
0x12ec   :  { %v2125_v63 = vmul.f32 %v5091_v62, %v2109_v46 }
0x12ee   :  { %v2796_v6 = vpop.f32.mrb[88].mxu0  ;;  %v2748_v13 = vpop.f32.mrb[88].mxu1  ;;  %v2133_v42 = vmul.f32 %v5745_v21, %v2125_v63 }
0x12ef   :  { %v2852_v14 = vpack.c.bf16 %v2796_v6, %v2796_v6  ;;  %v2851_v15 = vpack.c.bf16 %v2748_v13, %v2748_v13  ;;  %v4806_v11 = vpop.f32.mrb[89].mxu0  ;;  %v4800_v0 = vpop.f32.mrb[89].mxu1 }
0x12f0   :  { %v2799_v28 = vpop.f32.mrb[90].mxu0  ;;  %v2751_v61 = vpop.f32.mrb[90].mxu1  ;;  %v5919_v21 = vadd.f32 %v5748_v18, %v2133_v42 }
0x12f1   :  { %v4807_v12 = vpop.f32.mrb[91].mxu0  ;;  %4829 = vmatmul.mubr.msk.bf16.vlgmr.msra.gmra.mrb[96].mxu0 %vm452_vm3, %v2852_v14  ;;  %v4801_v51 = vpop.f32.mrb[91].mxu1  ;;  %4823 = vmatmul.mubr.msk.bf16.vlgmr.msra.gmra.mrb[96].mxu1 %vm452_vm3, %v2851_v15 }
0x12f2   :  { %4839 = vmatpush3.bf16.msra.mxu0 %v5725_v7  ;;  %4833 = vmatpush3.bf16.msra.mxu1 %v5909_v19  ;;  %v3045_v56 = vpack.c.bf16 %v5919_v21, %v5919_v21 }
0x12f3   :  { %4840 = vmatprep.subr.bf16.mxu0 %v5171_v1  ;;  %4842 = vmatprep.mubr.msk.bf16.mxu0 %vm5172_vm0, %v5171_v1 }
0x12f4   :  { %4834 = vmatprep.mubr.msk.bf16.mxu1 %vm5172_vm0, %v5171_v1  ;;  %4846 = vmatprep.subr.bf16.mxu1 %v5171_v1 }
0x12f6   :  { %4841 = vmatpush3.bf16.msra.mxu0 %v5733_v54  ;;  %v2844_v17 = vpop.f32.mrb[92].mxu1 }
0x12f7   :  { %v2853_v38 = vpack.c.bf16 %v2844_v17, %v2844_v17  ;;  %v4812_v7 = vpop.f32.mrb[93].mxu1  ;;  %4854 = vmatprep.subr.bf16.mxu0 %v5171_v1 }
0x12f8   :  { %v2847_v47 = vpop.f32.mrb[94].mxu1 }
0x12f9   :  { %4843 = vmatmul.mubr.msk.bf16.vlgmr.msra.gmra.mrb[100].mxu0 %vm245_vm2, %v3045_v56  ;;  %v4813_v18 = vpop.f32.mrb[95].mxu1  ;;  %4835 = vmatmul.mubr.msk.bf16.vlgmr.msra.gmra.mrb[100].mxu1 %vm452_vm3, %v2853_v38 }
0x12fa   :  { %4855 = vmatpush3.bf16.msra.mxu0 %v5728_v49  ;;  %4847 = vmatpush3.bf16.msra.mxu1 %v5755_v3 }
0x12fb   :  { %4856 = vmatprep.subr.bf16.mxu0 %v5171_v1  ;;  %4848 = vmatprep.subr.bf16.mxu1 %v5171_v1 }
0x12fc   :  { %4858 = vmatprep.mubr.msk.bf16.mxu0 %vm5172_vm0, %v5171_v1  ;;  %4850 = vmatprep.mubr.msk.bf16.mxu1 %vm5172_vm0, %v5171_v1 }
0x12fe   :  { %4857 = vmatpush3.bf16.msra.mxu0 %v5736_v8  ;;  %4849 = vmatpush3.bf16.msra.mxu1 %v5763_v4 }
0x12ff   :  { %4862 = vmatprep.subr.bf16.mxu1 %v5171_v1  ;;  %4870 = vmatprep.subr.bf16.mxu0 %v5171_v1 }
0x1301   :  { %4859 = vmatmul.mubr.msk.bf16.vlgmr.msra.gmra.mrb[104].mxu0 %vm245_vm2, %v3045_v56  ;;  %4851 = vmatmul.mubr.msk.bf16.vlgmr.msra.gmra.mrb[104].mxu1 %vm245_vm2, %v3045_v56 }
0x1302   :  { %4863 = vmatpush3.bf16.msra.mxu1 %v5772_v9  ;;  %4866 = vmatprep.mubr.msk.bf16.mxu1 %vm5172_vm0, %v5171_v1 }
0x1303   :  { %4864 = vmatprep.subr.bf16.mxu1 %v5171_v1  ;;  %4872 = vmatprep.mubr.msk.bf16.mxu0 %vm5172_vm0, %v5171_v1 }
0x1306   :  { %4865 = vmatpush3.bf16.msra.mxu1 %v5778_v10 }
0x1307   :  { %4876 = vmatprep.subr.bf16.mxu1 %v5171_v1 }
0x1309   :  { %4867 = vmatmul.mubr.msk.bf16.vlgmr.msra.gmra.mrb[108].mxu1 %vm245_vm2, %v3045_v56 }
0x130a   :  { %4878 = vmatprep.mubr.msk.bf16.mxu1 %vm5172_vm0, %v5171_v1 }
0x13bb   :  { %v2894_v49 = vpop.f32.mrb[92].mxu0 }
0x13bc   :  { %v4818_v54 = vpop.f32.mrb[93].mxu0  ;;  %v3038_v34 = vsel %vm245_vm2, %v2894_v49, 0.0 }
0x13bd   :  { %v2897_v8 = vpop.f32.mrb[94].mxu0 }
0x13be   :  { %v4819_v3 = vpop.f32.mrb[95].mxu0 }
0x13bf   :  { %v5117_v3 = vld [vmem:[%s5195_s13 + $0x8] sm:$0xff]  ;;  %s6136_s13 = sld [smem:[#allocation11_spill]] }
0x13c4   :  { %v2986_v4 = vpop.f32.mrb[96].mxu0  ;;  %v2940_v9 = vpop.f32.mrb[96].mxu1 }
0x13c5   :  { %v3039_v16 = vsel %vm245_vm2, %v2940_v9, 0.0  ;;  %v4830_v31 = vpop.f32.mrb[97].mxu0  ;;  %v4824_v23 = vpop.f32.mrb[97].mxu1  ;;  %v3041_v27 = vsel %vm245_vm2, %v2986_v4, 0.0 }
0x13c6   :  { %v3040_v10 = vadd.f32 %v3039_v16, %v3038_v34  ;;  %v2989_v25 = vpop.f32.mrb[98].mxu0  ;;  %v2943_v26 = vpop.f32.mrb[98].mxu1 }
0x13c7   :  { %v4831_v32 = vpop.f32.mrb[99].mxu0  ;;  %v4825_v37 = vpop.f32.mrb[99].mxu1 }
0x13c8   :  { %v3042_v39 = vadd.f32 %v3041_v27, %v3040_v10 }
0x13cc   :  { %v3083_v40 = vpop.f32.mrb[100].mxu0  ;;  %v3032_v44 = vpop.f32.mrb[100].mxu1 }
0x13cd   :  { %v3084_v46 = vadd.f32 %v5789_v58, %v3083_v40  ;;  %v3043_v41 = vsel %vm245_vm2, %v3032_v44, 0.0  ;;  %v4844_v20 = vpop.f32.mrb[101].mxu0  ;;  %v4836_v48 = vpop.f32.mrb[101].mxu1 }
0x13ce   :  { %v5960_v29 = vadd.f32 %v3043_v41, %v3042_v39  ;;  %v3086_v30 = vpop.f32.mrb[102].mxu0  ;;  %v3035_v52 = vpop.f32.mrb[102].mxu1 }
0x13cf   :  { %v5962_v53 = vpack.c.bf16 %v3084_v46, %v3084_v46  ;;  %v4845_v55 = vpop.f32.mrb[103].mxu0  ;;  %v4837_v33 = vpop.f32.mrb[103].mxu1 }
0x13d1   :  { %3214 = vrot.lane.b32.xlu0 %v5962_v53, %s5173_s0 }
0x13d4   :  { %v3163_v24 = vpop.f32.mrb[104].mxu0  ;;  %v3123_v57 = vpop.f32.mrb[104].mxu1 }
0x13d5   :  { %v3164_v60 = vadd.f32 %v5792_v43, %v3163_v24  ;;  %v3124_v58 = vadd.f32 %v5801_v35, %v3123_v57  ;;  %v4860_v36 = vpop.f32.mrb[105].mxu0  ;;  %v4852_v62 = vpop.f32.mrb[105].mxu1 }
0x13d6   :  { %v3166_v63 = vpop.f32.mrb[106].mxu0  ;;  %v3126_v5 = vpop.f32.mrb[106].mxu1 }
0x13d7   :  { %v5968_v6 = vpack.c.bf16 %v3164_v60, %v3164_v60  ;;  %v5970_v13 = vpack.c.bf16 %v3124_v58, %v3124_v58  ;;  %v4861_v42 = vpop.f32.mrb[107].mxu0  ;;  %v4853_v14 = vpop.f32.mrb[107].mxu1 }
0x13d9   :  { %3312 = vrot.lane.b32.xlu0 %v5968_v6, %s5173_s0  ;;  %3263 = vrot.lane.b32.xlu1 %v5970_v13, %s5173_s0 }
0x13dc   :  { %v3203_v15 = vpop.f32.mrb[108].mxu1 }
0x13dd   :  { %v3204_v43 = vadd.f32 %v5813_v45, %v3203_v15  ;;  %v4868_v35 = vpop.f32.mrb[109].mxu1 }
0x13de   :  { %v3206_v11 = vpop.f32.mrb[110].mxu1 }
0x13df   :  { %v5977_v0 = vpack.c.bf16 %v3204_v43, %v3204_v43  ;;  %v4869_v28 = vpop.f32.mrb[111].mxu1 }
0x13e1   :  { %3361 = vrot.lane.b32.xlu1 %v5977_v0, %s5173_s0 }
0x1443   :  { %v3215_v61 = vpop.permute.xlu0 %3214 }
0x1444   :  { %v3220_v12 = vsel %vm452_vm3, %v3215_v61, 0 }
0x1445   :  { %4871 = vmatpush3.bf16.xpose.msra.mxu0 %v3220_v12 }
0x1446   :  { %4882 = vmatprep.subr.bf16.mxu0 %v5171_v1 }
0x144b   :  { %v3313_v51 = vpop.permute.xlu0 %3312  ;;  %v3264_v17 = vpop.permute.xlu1 %3263 }
0x144c   :  { %v3318_v38 = vsel %vm452_vm3, %v3313_v51, 0  ;;  %v3269_v45 = vsel %vm452_vm3, %v3264_v17, 0  ;;  %4873 = vmatmul.mubr.msk.bf16.vlgmr.msra.gmra.mrb[108].mxu0 %vm452_vm3, %v5962_v53 }
0x144d   :  { %4883 = vmatpush3.bf16.xpose.msra.mxu0 %v3318_v38  ;;  %4877 = vmatpush3.bf16.xpose.msra.mxu1 %v3269_v45 }
0x144e   :  { %4884 = vmatprep.mubr.msk.bf16.mxu0 %vm5172_vm0, %v5171_v1  ;;  %4888 = vmatprep.subr.bf16.mxu1 %v5171_v1 }
0x144f   :  { %4894 = vmatprep.subr.bf16.mxu0 %v5171_v1 }
0x1453   :  { %v3362_v7 = vpop.permute.xlu1 %3361 }
0x1454   :  { %v3367_v56 = vsel %vm452_vm3, %v3362_v7, 0  ;;  %4885 = vmatmul.mubr.msk.bf16.vlgmr.msra.gmra.mrb[112].mxu0 %vm452_vm3, %v5968_v6  ;;  %4879 = vmatmul.mubr.msk.bf16.vlgmr.msra.gmra.mrb[112].mxu1 %vm452_vm3, %v5970_v13  ;;  %v6025_v7 = vld [vmem:[%s6136_s13] ss:$0 sm:$0xff] }
0x1455   :  { %4889 = vmatpush3.bf16.xpose.msra.mxu1 %v3367_v56  ;;  %4890 = vmatprep.mubr.msk.bf16.mxu1 %vm5172_vm0, %v5171_v1  ;;  %v3847_v56 = vadd.f32 %v6025_v7, %v5960_v29 }
0x1456   :  { %4896 = vmatprep.mubr.msk.bf16.mxu0 %vm5172_vm0, %v5171_v1  ;;  %4900 = vmatprep.subr.bf16.mxu1 %v5171_v1 }
0x145c   :  { %4891 = vmatmul.mubr.msk.bf16.vlgmr.msra.gmra.mrb[116].mxu1 %vm452_vm3, %v5977_v0 }
0x145d   :  { %4902 = vmatprep.mubr.msk.bf16.mxu1 %vm5172_vm0, %v5171_v1 }
0x151f   :  { %v3256_v47 = vpop.f32.mrb[108].mxu0 }
0x1520   :  { %v3409_v18 = vmul.f32 0.35355338, %v3256_v47  ;;  %v4874_v49 = vpop.f32.mrb[109].mxu0  ;;  %v3849_v47 = vadd.f32 %v3847_v56, %v5752_v2 }
0x1521   :  { %v3259_v54 = vpop.f32.mrb[110].mxu0 }
0x1522   :  { %v4875_v8 = vpop.f32.mrb[111].mxu0  ;;  %v3413_v4 = vadd.f32 %v5117_v3, %v3409_v18  ;;  %v3853_v18 = vsel %vm245_vm2, %v3849_v47, 0.0 }
0x1524   :  { %v3417_v9 = vsel %vm452_vm3, %v3413_v4, -inf }
0x1525   :  { %3418 = vmax.xlane.f32.xlu0 %v3417_v9 }
0x1527   :  { %v3354_v34 = vpop.f32.mrb[112].mxu0  ;;  %v3305_v16 = vpop.f32.mrb[112].mxu1 }
0x1528   :  { %v3411_v31 = vmul.f32 0.35355338, %v3354_v34  ;;  %v3410_v23 = vmul.f32 0.35355338, %v3305_v16  ;;  %v4886_v10 = vpop.f32.mrb[113].mxu0  ;;  %v4880_v25 = vpop.f32.mrb[113].mxu1 }
0x1529   :  { %v3357_v26 = vpop.f32.mrb[114].mxu0  ;;  %v3308_v27 = vpop.f32.mrb[114].mxu1 }
0x152a   :  { %v4887_v32 = vpop.f32.mrb[115].mxu0  ;;  %v4881_v37 = vpop.f32.mrb[115].mxu1  ;;  %v3415_v39 = vadd.f32 %v5117_v3, %v3411_v31  ;;  %v3414_v40 = vadd.f32 %v5117_v3, %v3410_v23 }
0x152c   :  { %v3423_v44 = vsel %vm452_vm3, %v3415_v39, -inf  ;;  %v3420_v46 = vsel %vm452_vm3, %v3414_v40, -inf }
0x152d   :  { %3424 = vmax.xlane.f32.xlu0 %v3423_v44  ;;  %3421 = vmax.xlane.f32.xlu1 %v3420_v46 }
0x152f   :  { %v3403_v41 = vpop.f32.mrb[116].mxu1 }
0x1530   :  { %v3412_v20 = vmul.f32 0.35355338, %v3403_v41  ;;  %v4892_v48 = vpop.f32.mrb[117].mxu1 }
0x1531   :  { %v3406_v30 = vpop.f32.mrb[118].mxu1 }
0x1532   :  { %v4893_v52 = vpop.f32.mrb[119].mxu1  ;;  %v3416_v55 = vadd.f32 %v5117_v3, %v3412_v20 }
0x1534   :  { %v3426_v33 = vsel %vm452_vm3, %v3416_v55, -inf }
0x1535   :  { %3427 = vmax.xlane.f32.xlu0 %v3426_v33 }
0x153e   :  { %3465 = vrot.lane.b32.xlu1 %v5962_v53, %s5174_s5 }
0x15b2   :  { %v3419_v24 = vpop.xlane.xlu0 %3418 }
0x15b3   :  { %v3429_v57 = vsub.f32 %v3413_v4, %v3419_v24 }
0x15b5   :  { %v3433_v60 = vmul.f32 1.442695, %v3429_v57 }
0x15b7   :  { %5092 = vpow2.f32 %v3433_v60 }
0x15ba   :  { %v3425_v58 = vpop.xlane.xlu0 %3424  ;;  %v3422_v36 = vpop.xlane.xlu1 %3421 }
0x15bb   :  { %v3431_v62 = vsub.f32 %v3415_v39, %v3425_v58  ;;  %v3430_v63 = vsub.f32 %v3414_v40, %v3422_v36 }
0x15bd   :  { %v3437_v5 = vmul.f32 1.442695, %v3431_v62  ;;  %v3435_v42 = vmul.f32 1.442695, %v3430_v63 }
0x15be   :  { %v3466_v14 = vpop.permute.xlu1 %3465 }
0x15bf   :  { %5094 = vpow2.f32 %v3437_v5  ;;  %v3471_v15 = vsel %vm707_vm4, %v3466_v14, 0 }
0x15c0   :  { %5096 = vpow2.f32 %v3435_v42  ;;  %4895 = vmatpush3.bf16.msra.mxu0 %v3471_v15 }
0x15c1   :  { %v5093_v43 = vpop.eup %5092  ;;  %4906 = vmatprep.subr.bf16.mxu0 %v5171_v1 }
0x15c2   :  { %v3441_v53 = vsel %vm452_vm3, %v5093_v43, 0.0  ;;  %v3428_v35 = vpop.xlane.xlu0 %3427 }
0x15c3   :  { %3442 = vadd.xlane.f32.xlu1 %v3441_v53  ;;  %v3432_v11 = vsub.f32 %v3416_v55, %v3428_v35 }
0x15c5   :  { %v3439_v28 = vmul.f32 1.442695, %v3432_v11 }
0x15c7   :  { %5098 = vpow2.f32 %v3439_v28 }
0x15c9   :  { %v5095_v61 = vpop.eup %5094 }
0x15ca   :  { %v5097_v12 = vpop.eup %5096  ;;  %v3447_v51 = vsel %vm452_vm3, %v5095_v61, 0.0 }
0x15cb   :  { %3448 = vadd.xlane.f32.xlu1 %v3447_v51  ;;  %v3444_v17 = vsel %vm452_vm3, %v5097_v12, 0.0 }
0x15cc   :  { %3445 = vadd.xlane.f32.xlu0 %v3444_v17 }
0x15d1   :  { %v5099_v38 = vpop.eup %5098 }
0x15d2   :  { %v3450_v45 = vsel %vm452_vm3, %v5099_v38, 0.0 }
0x15d3   :  { %3451 = vadd.xlane.f32.xlu0 %v3450_v45 }
0x15dc   :  { %3561 = vrot.lane.b32.xlu1 %v5968_v6, %s5174_s5 }
0x15e0   :  { %3609 = vrot.lane.b32.xlu1 %v5977_v0, %s5174_s5 }
0x15e9   :  { %3513 = vrot.lane.b32.xlu0 %v5970_v13, %s5174_s5 }
0x1608   :  { %3854 = vadd.xlane.f32.xlu0 %v3853_v18 }
0x1650   :  { %v3443_v49 = vpop.xlane.xlu1 %3442 }
0x1651   :  { %5100 = vrcp.f32 %v3443_v49 }
0x1658   :  { %v3449_v54 = vpop.xlane.xlu1 %3448 }
0x1659   :  { %5102 = vrcp.f32 %v3449_v54  ;;  %v3446_v6 = vpop.xlane.xlu0 %3445 }
0x165a   :  { %5104 = vrcp.f32 %v3446_v6 }
0x165b   :  { %v5101_v0 = vpop.eup %5100 }
0x165c   :  { %v3457_v8 = vmul.f32 %v5101_v0, %v5093_v43  ;;  %v3562_v3 = vpop.permute.xlu1 %3561 }
0x165d   :  { %v3567_v4 = vsel %vm707_vm4, %v3562_v3, 0 }
0x165e   :  { %v3461_v13 = vpack.c.bf16 %v3457_v8, %v3457_v8 }
0x1660   :  { %4897 = vmatmul.mubr.msk.bf16.vlgmr.msra.gmra.mrb[116].mxu0 %vm452_vm3, %v3461_v13  ;;  %v3452_v29 = vpop.xlane.xlu0 %3451  ;;  %v3610_v10 = vpop.permute.xlu1 %3609 }
0x1661   :  { %4907 = vmatpush3.bf16.msra.mxu0 %v3567_v4  ;;  %5106 = vrcp.f32 %v3452_v29  ;;  %4908 = vmatprep.mubr.msk.bf16.mxu0 %vm5172_vm0, %v5171_v1  ;;  %v3615_v27 = vsel %vm707_vm4, %v3610_v10, 0 }
0x1662   :  { %4918 = vmatprep.subr.bf16.mxu0 %v5171_v1 }
0x1663   :  { %v5103_v2 = vpop.eup %5102 }
0x1664   :  { %v5105_v9 = vpop.eup %5104  ;;  %v3459_v34 = vmul.f32 %v5103_v2, %v5095_v61  ;;  %v3514_v16 = vpop.permute.xlu0 %3513 }
0x1665   :  { %v3458_v31 = vmul.f32 %v5105_v9, %v5097_v12  ;;  %v3519_v23 = vsel %vm707_vm4, %v3514_v16, 0 }
0x1666   :  { %4901 = vmatpush3.bf16.msra.mxu1 %v3519_v23  ;;  %v3463_v25 = vpack.c.bf16 %v3459_v34, %v3459_v34 }
0x1667   :  { %v3462_v26 = vpack.c.bf16 %v3458_v31, %v3458_v31  ;;  %4912 = vmatprep.subr.bf16.mxu1 %v5171_v1 }
0x1668   :  { %4909 = vmatmul.mubr.msk.bf16.vlgmr.msra.gmra.mrb[120].mxu0 %vm452_vm3, %v3463_v25 }
0x1669   :  { %4903 = vmatmul.mubr.msk.bf16.vlgmr.msra.gmra.mrb[120].mxu1 %vm452_vm3, %v3462_v26  ;;  %4919 = vmatpush3.bf16.msra.mxu0 %v5887_v22  ;;  %v5030_v26 = vld [vmem:[%s6137_s8] sm:$0xff]  }
0x166a   :  { %4913 = vmatpush3.bf16.msra.mxu1 %v3615_v27  ;;  %4914 = vmatprep.mubr.msk.bf16.mxu1 %vm5172_vm0, %v5171_v1  ;;  %v5031_v27 = vld [vmem:[%s6137_s8 + $0x8] sm:$0xff]  }
0x166b   :  { %v5107_v32 = vpop.eup %5106  ;;  %4920 = vmatprep.mubr.msk.bf16.mxu0 %vm5172_vm0, %v5171_v1  ;;  %4930 = vmatprep.subr.bf16.mxu0 %v5171_v1 }
0x166c   :  { %v3460_v37 = vmul.f32 %v5107_v32, %v5099_v38  ;;  %4924 = vmatprep.subr.bf16.mxu1 %v5171_v1 }
0x166e   :  { %v3464_v39 = vpack.c.bf16 %v3460_v37, %v3460_v37 }
0x1671   :  { %4915 = vmatmul.mubr.msk.bf16.vlgmr.msra.gmra.mrb[124].mxu1 %vm452_vm3, %v3464_v39 }
0x1672   :  { %4925 = vmatpush3.bf16.msra.mxu1 %v5893_v50  ;;  %4926 = vmatprep.mubr.msk.bf16.mxu1 %vm5172_vm0, %v5171_v1 }
0x1673   :  { %4936 = vmatprep.subr.bf16.mxu1 %v5171_v1 }
0x1695   :  { %v3855_v22 = vpop.xlane.xlu0 %3854 }
0x1696   :  { %v3859_v40 = vmul.f32 0.03125, %v3855_v22 }
0x1698   :  { %v6053_v44 = vsub.f32 %v3849_v47, %v3859_v40 }
0x169a   :  { %v3863_v46 = vmul.f32 %v6053_v44, %v6053_v44 }
0x169c   :  { %v3865_v41 = vsel %vm245_vm2, %v3863_v46, 0.0 }
0x169d   :  { %3866 = vadd.xlane.f32.xlu0 %v3865_v41 }
0x172a   :  { %v3867_v32 = vpop.xlane.xlu0 %3866 }
0x172b   :  { %v3871_v37 = vmul.f32 0.03125, %v3867_v32 }
0x172d   :  { %v3873_v39 = vadd.f32 1e-05, %v3871_v37 }
0x172f   :  { %5108 = vrsqrt.f32 %v3873_v39 }
0x1733   :  { %v3507_v20 = vpop.f32.mrb[116].mxu0 }
0x1734   :  { %v3657_v48 = vpack.c.bf16 %v3507_v20, %v3507_v20  ;;  %v4898_v30 = vpop.f32.mrb[117].mxu0 }
0x1735   :  { %v3510_v52 = vpop.f32.mrb[118].mxu0 }
0x1736   :  { %v4899_v50 = vpop.f32.mrb[119].mxu0  ;;  %4921 = vmatmul.mubr.msk.bf16.vlgmr.msra.gmra.mrb[124].mxu0 %vm452_vm3, %v3657_v48  ;;  %v4320_v48 = vld [vmem:[%s6139_s19] ss:$0 sm:$0xff] }
0x1737   :  { %4931 = vmatpush3.bf16.msra.mxu0 %v5899_v59  ;;  %4932 = vmatprep.mubr.msk.bf16.mxu0 %vm5172_vm0, %v5171_v1 }
0x1738   :  { %4942 = vmatprep.subr.bf16.mxu0 %v5171_v1 }
0x1739   :  { %v5109_v41 = vpop.eup %5108 }
0x173a   :  { %v3877_v20 = vmul.f32 %v5109_v41, %v6053_v44  ;;  %v5035_v44 = vld [vmem:[%s6138_s14 + $0x18] sm:$0xff]  }
0x173b   :  { %v3603_v55 = vpop.f32.mrb[120].mxu0 }
0x173c   :  { %v3659_v33 = vpack.c.bf16 %v3603_v55, %v3603_v55  ;;  %v4910_v24 = vpop.f32.mrb[121].mxu0  ;;  %v3555_v57 = vpop.f32.mrb[120].mxu1  ;;  %v3885_v52 = vmul.f32 %v4320_v48, %v3877_v20  ;;  %v4321_v55 = vld [vmem:[%s6140_s24] ss:$0 sm:$0xff] }
0x173d   :  { %v3658_v60 = vpack.c.bf16 %v3555_v57, %v3555_v57  ;;  %v3606_v58 = vpop.f32.mrb[122].mxu0  ;;  %v4904_v36 = vpop.f32.mrb[121].mxu1 }
0x173e   :  { %v4911_v62 = vpop.f32.mrb[123].mxu0  ;;  %4933 = vmatmul.mubr.msk.bf16.vlgmr.msra.gmra.mrb[128].mxu0 %vm452_vm3, %v3659_v33  ;;  %v3558_v63 = vpop.f32.mrb[122].mxu1  ;;  %v3893_v24 = vadd.f32 %v4321_v55, %v3885_v52  ;;  %v5034_v58 = vld [vmem:[%s6138_s14 + $0x10] sm:$0xff]   ;;  %v4322_v36 = vld [vmem:[%s6141_s30] ss:$0 sm:$0xff] }
0x173f   :  { %v4905_v5 = vpop.f32.mrb[123].mxu1  ;;  %4927 = vmatmul.mubr.msk.bf16.vlgmr.msra.gmra.mrb[128].mxu1 %vm452_vm3, %v3658_v60  ;;  %4946 = vmatprep.mubr.msk.bf16.mxu0 %vm5172_vm0, %v5171_v1 }
0x1740   :  { %4937 = vmatpush3.bf16.msra.mxu1 %v5909_v19  ;;  %4938 = vmatprep.mubr.msk.bf16.mxu1 %vm5172_vm0, %v5171_v1 }
0x1741   :  { %4950 = vmatprep.subr.bf16.mxu1 %v5171_v1  ;;  %4943 = vmatpush3.bf16.msra.mxu0 %v5030_v26 }
0x1742   :  { %4944 = vmatprep.subr.bf16.mxu0 %v5171_v1 }
0x1744   :  { %v3651_v59 = vpop.f32.mrb[124].mxu1 }
0x1745   :  { %v3660_v42 = vpack.c.bf16 %v3651_v59, %v3651_v59  ;;  %v4916_v14 = vpop.f32.mrb[125].mxu1  ;;  %4945 = vmatpush3.bf16.msra.mxu0 %v5031_v27 }
0x1746   :  { %v3654_v15 = vpop.f32.mrb[126].mxu1 }
0x1747   :  { %v4917_v43 = vpop.f32.mrb[127].mxu1  ;;  %4939 = vmatmul.mubr.msk.bf16.vlgmr.msra.gmra.mrb[132].mxu1 %vm452_vm3, %v3660_v42 }
0x1748   :  { %4958 = vmatprep.mubr.msk.bf16.mxu1 %vm5172_vm0, %v5171_v1 }
0x1809   :  { %v3698_v53 = vpop.f32.mrb[124].mxu0 }
0x180a   :  { %v4922_v35 = vpop.f32.mrb[125].mxu0  ;;  %v3833_v51 = vsel %vm245_vm2, %v3698_v53, 0.0 }
0x180b   :  { %v3701_v11 = vpop.f32.mrb[126].mxu0  ;;  %v4326_v35 = vld [vmem:[%s5315_s17] ss:$0 sm:$0xff]  ;;  %s6142_s17 = sld [smem:[#allocation5_spill]] }
0x180c   :  { %v4923_v28 = vpop.f32.mrb[127].mxu0 }
0x1811   :  { %v3784_v19 = vpop.f32.mrb[128].mxu0 }
0x1812   :  { %v4934_v61 = vpop.f32.mrb[129].mxu0  ;;  %v3741_v12 = vpop.f32.mrb[128].mxu1  ;;  %v3836_v49 = vsel %vm245_vm2, %v3784_v19, 0.0 }
0x1813   :  { %v3834_v17 = vsel %vm245_vm2, %v3741_v12, 0.0  ;;  %v3787_v38 = vpop.f32.mrb[130].mxu0  ;;  %v4928_v45 = vpop.f32.mrb[129].mxu1 }
0x1814   :  { %v3835_v56 = vadd.f32 %v3834_v17, %v3833_v51  ;;  %v4935_v47 = vpop.f32.mrb[131].mxu0  ;;  %v3744_v18 = vpop.f32.mrb[130].mxu1 }
0x1815   :  { %v4929_v54 = vpop.f32.mrb[131].mxu1 }
0x1816   :  { %v3837_v6 = vadd.f32 %v3836_v49, %v3835_v56 }
0x181a   :  { %v3827_v0 = vpop.f32.mrb[132].mxu1 }
0x181b   :  { %v3838_v8 = vsel %vm245_vm2, %v3827_v0, 0.0  ;;  %v4940_v3 = vpop.f32.mrb[133].mxu1 }
0x181c   :  { %v3839_v13 = vadd.f32 %v3838_v8, %v3837_v6  ;;  %v3830_v4 = vpop.f32.mrb[134].mxu1 }
0x181d   :  { %v4941_v29 = vpop.f32.mrb[135].mxu1  ;;  %v5175_v4 = vmov 0.0|0.0  }
0x181e   :  { %v3848_v2 = vadd.f32 %v6025_v7, %v3839_v13  ;;  %v5032_v7 = vld [vmem:[%s6138_s14] sm:$0xff]   ;;  %4969 = vmatprep.subr.bf16.mxu0 %v5175_v4 }
0x181f   :  { %4951 = vmatpush3.bf16.msra.mxu1 %v5032_v7 }
0x1820   :  { %v3850_v9 = vadd.f32 %v3848_v2, %v5919_v21  ;;  %v5033_v21 = vld [vmem:[%s6138_s14 + $0x8] sm:$0xff]   ;;  %4952 = vmatprep.subr.bf16.mxu1 %v5171_v1 }
0x1822   :  { %v3856_v34 = vsel %vm245_vm2, %v3850_v9, 0.0 }
0x1823   :  { %3857 = vadd.xlane.f32.xlu1 %v3856_v34  ;;  %4953 = vmatpush3.bf16.msra.mxu1 %v5033_v21  ;;  %v4333_v21 = vld [vmem:[%s5325_s27] ss:$0 sm:$0xff] }
0x1824   :  { %4954 = vmatprep.subr.bf16.mxu1 %v5171_v1 }
0x1827   :  { %4955 = vmatpush3.bf16.msra.mxu1 %v5034_v58 }
0x1828   :  { %4956 = vmatprep.subr.bf16.mxu1 %v5171_v1 }
0x182b   :  { %4957 = vmatpush3.bf16.msra.mxu1 %v5035_v44 }
0x18b0   :  { %v3858_v16 = vpop.xlane.xlu1 %3857 }
0x18b1   :  { %v3860_v31 = vmul.f32 0.03125, %v3858_v16 }
0x18b3   :  { %v3862_v23 = vsub.f32 %v3850_v9, %v3860_v31 }
0x18b5   :  { %v3864_v10 = vmul.f32 %v3862_v23, %v3862_v23 }
0x18b7   :  { %v3868_v25 = vsel %vm245_vm2, %v3864_v10, 0.0  ;;  %v4332_v10 = vld [vmem:[%s5320_s20] ss:$0 sm:$0xff]  ;;  %s5118_s20 = scalar_lea.vmem %s4178_s12, 32 }
0x18b8   :  { %3869 = vadd.xlane.f32.xlu0 %v3868_v25  ;;  %p5119_p0 = scmp.ne.s32.totalorder %s4178_s12, %s5118_s20  ;;  %p5124_p2 = scmp.lt.s32.totalorder %s5118_s20, %s5118_s20 }
0x18ba   :  { %p5125_p3 = por %p5124_p2, %p5123_p1 }
0x18bc   :  { %p5126_p4 = pnand %p5125_p3, %p5119_p0 }
0x1945   :  { %v3870_v22 = vpop.xlane.xlu0 %3869 }
0x1946   :  { %v3872_v40 = vmul.f32 0.03125, %v3870_v22 }
0x1948   :  { %v3874_v46 = vadd.f32 1e-05, %v3872_v40  ;;  %v4095_v40 = vld [vmem:[%s6142_s17] sm:$0x3] }
0x194a   :  { %5110 = vrsqrt.f32 %v3874_v46 }
0x1954   :  { %v5111_v30 = vpop.eup %5110 }
0x1955   :  { %v3878_v50 = vmul.f32 %v5111_v30, %v3862_v23 }
0x1957   :  { %v3886_v33 = vmul.f32 %v4320_v48, %v3878_v50 }
0x1959   :  { %v3894_v57 = vadd.f32 %v4321_v55, %v3886_v33 }
0x195b   :  { %v3899_v60 = vpack.c.bf16 %v3894_v57, %v3893_v24 }
0x195d   :  { %4947 = vmatmul.mubr.msk.bf16.vlgmr.msra.gmra.mrb[132].mxu0 %vm245_vm2, %v3899_v60 }
0x195e   :  { %4966 = vmatprep.mubr.msk.f32.mxu0 %vm5172_vm0, %v5171_v1 }
0x1a30   :  { %v3956_v62 = vpop.f32.mrb[132].mxu0 }
0x1a31   :  { %v3957_v63 = vadd.f32 %v4322_v36, %v3956_v62  ;;  %v4948_v5 = vpop.f32.mrb[133].mxu0 }
0x1a32   :  { %v3959_v59 = vpop.f32.mrb[134].mxu0 }
0x1a33   :  { %v3960_v42 = vadd.f32 %v4322_v36, %v3959_v59  ;;  %v4949_v14 = vpop.f32.mrb[135].mxu0  ;;  %v3963_v15 = vmax.f32 %v3957_v63, 0.0 }
0x1a35   :  { %v3964_v43 = vmax.f32 %v3960_v42, 0.0 }
0x1a37   :  { %v3973_v53 = vpack.c.bf16 %v3964_v43, %v3963_v15 }
0x1a39   :  { %4959 = vmatmul.mubr.msk.bf16.vlgmr.msra.gmra.mrb[136].mxu1 %vm2051_vm5, %v3973_v53 }
0x1b0c   :  { %v4042_v11 = vpop.f32.mrb[136].mxu1 }
0x1b0d   :  { %v4043_v28 = vadd.f32 %v4326_v35, %v4042_v11  ;;  %v4960_v19 = vpop.f32.mrb[137].mxu1 }
0x1b0e   :  { %v4045_v61 = vpop.f32.mrb[138].mxu1 }
0x1b0f   :  { %v4046_v1 = vadd.f32 %v4326_v35, %v4045_v61  ;;  %v4961_v12 = vpop.f32.mrb[139].mxu1  ;;  %v4049_v51 = vadd.f32 %v4043_v28, %v3893_v24 }
0x1b11   :  { %v4053_v17 = vsel %vm245_vm2, %v4049_v51, 0.0  ;;  %v4050_v38 = vadd.f32 %v4046_v1, %v3894_v57 }
0x1b12   :  { %4054 = vadd.xlane.f32.xlu1 %v4053_v17 }
0x1b13   :  { %v4056_v45 = vsel %vm245_vm2, %v4050_v38, 0.0 }
0x1b14   :  { %4057 = vadd.xlane.f32.xlu0 %v4056_v45 }
0x1b9f   :  { %v4055_v56 = vpop.xlane.xlu1 %4054 }
0x1ba0   :  { %v4059_v47 = vmul.f32 0.03125, %v4055_v56 }
0x1ba1   :  { %v4058_v18 = vpop.xlane.xlu0 %4057 }
0x1ba2   :  { %v4061_v49 = vsub.f32 %v4049_v51, %v4059_v47  ;;  %v4060_v54 = vmul.f32 0.03125, %v4058_v18 }
0x1ba4   :  { %v4062_v6 = vsub.f32 %v4050_v38, %v4060_v54  ;;  %v4063_v0 = vmul.f32 %v4061_v49, %v4061_v49 }
0x1ba6   :  { %v4065_v8 = vsel %vm245_vm2, %v4063_v0, 0.0  ;;  %v4064_v3 = vmul.f32 %v4062_v6, %v4062_v6 }
0x1ba7   :  { %4066 = vadd.xlane.f32.xlu1 %v4065_v8 }
0x1ba8   :  { %v4068_v13 = vsel %vm245_vm2, %v4064_v3, 0.0 }
0x1ba9   :  { %4069 = vadd.xlane.f32.xlu0 %v4068_v13 }
0x1c34   :  { %v4067_v29 = vpop.xlane.xlu1 %4066 }
0x1c35   :  { %v4071_v2 = vmul.f32 0.03125, %v4067_v29 }
0x1c36   :  { %v4070_v9 = vpop.xlane.xlu0 %4069 }
0x1c37   :  { %v4073_v34 = vadd.f32 1e-05, %v4071_v2  ;;  %v4072_v16 = vmul.f32 0.03125, %v4070_v9 }
0x1c39   :  { %5112 = vrsqrt.f32 %v4073_v34  ;;  %v4074_v31 = vadd.f32 1e-05, %v4072_v16 }
0x1c3b   :  { %5114 = vrsqrt.f32 %v4074_v31 }
0x1c43   :  { %v5113_v23 = vpop.eup %5112 }
0x1c44   :  { %v4077_v25 = vmul.f32 %v5113_v23, %v4061_v49 }
0x1c45   :  { %v5115_v26 = vpop.eup %5114 }
0x1c46   :  { %v4078_v27 = vmul.f32 %v5115_v26, %v4062_v6  ;;  %v4085_v7 = vmul.f32 %v4332_v10, %v4077_v25 }
0x1c48   :  { %v4086_v32 = vmul.f32 %v4332_v10, %v4078_v27  ;;  %v4093_v37 = vadd.f32 %v4333_v21, %v4085_v7 }
0x1c4a   :  { %v4094_v39 = vadd.f32 %v4333_v21, %v4086_v32 }
0x1c4c   :  { %v4970_v22 = vpack.c.bf16 %v4094_v39, %v4093_v37 }
0x1c4e   :  { %4971 = vmatpush3.bf16.msra.mxu0 %v4970_v22 }
0x1c51   :  { %4967 = vmatmul.mubr.msk.f32.vlgmr.msra.gmra.mrb[136].mxu0 %vm137_vm1, %v4095_v40 }
0x1d24   :  { %v4165_v46 = vpop.f32.mrb[136].mxu0 }
0x1d25   :  { %4170 = vst.msk [vmem:[#allocation2] sm:$0x3] %vm4169_vm6, %v4165_v46  ;;  %v4968_v41 = vpop.f32.mrb[137].mxu0 }
0x1d26   :  { %5129 = shalt.err (!%p5126_p4)
}
0x1d27   :  { %s5130_s27 = scalar_lea.hbm %s5330_s4, 32 }
0x1d28   :  { %p5131_p5 = scmp.ne.s32.totalorder %s5330_s4, %s5130_s27  ;;  %p5134_p6 = scmp.lt.u32.totalorder %s5130_s27, %s5330_s4 }
0x1d2a   :  { %p5136_p7 = pnand %p5134_p6, %p5131_p5 }
0x1d2c   :  { %5139 = shalt.err (!%p5136_p7)
}
0x1d2d   :  { %4180 = dma.vmem_to_hbm [thread:$0]  %s4178_s12, 32, %s5330_s4, [#allocation3]  }
0x1d2e   :  { %5140 = dma.done.wait [#allocation3], 32  }
0x1d2f   :  { %5141 = vsyncadd [#allocation3], 4294967264 }
0x1d30   :  { %4184 = vsyncpa [#allocation3], 1 }

</bundles_post_ra>
